<compile_context>
chip_gen: v7x
topology: tpu7x:2x2x1
jax: 0.10.0
libtpu: 0.0.40
codegen_flags: <defaults>
</compile_context>

<pallas_src>
import functools

import jax
import jax.numpy as jnp
from jax.experimental import pallas as pl
from jax.experimental.pallas import tpu as pltpu


def cbow_kernel(ctx_ref, wemb_ref, wlin_ref, bias_ref, out_ref):
    # ctx_ref : (TB, V)  multi-hot context tile (caller's float dtype, values 0/1)
    # wemb_ref: (V, E)   f32 embedding weights (= embeddings.weight.T), resident
    # wlin_ref: (E, V)   f32 prediction weights (= linear.weight.T), resident
    # bias_ref: (1, V)   f32 prediction bias, resident
    # out_ref : (TB, V)  f32 log-probabilities
    ctx = ctx_ref[...]                                   # no explicit upcast / copy

    # sum of context embeddings: context @ W_emb.T -> (TB, E), f32 accumulation on MXU
    emb_sum = jnp.dot(ctx, wemb_ref[...], preferred_element_type=jnp.float32)

    # number of active tokens per row (context @ ones), f32 accumulate, guarded vs 0
    counts = jnp.sum(ctx, axis=-1, dtype=jnp.float32, keepdims=True)
    inv_counts = pl.reciprocal(jnp.maximum(counts, 1.0), approx=False)  # exact: (TB,1) only
    h = emb_sum * inv_counts                             # mean embedding (TB, E)

    # prediction layer: h @ W_lin.T + b -> (TB, V)
    logits = jnp.dot(h, wlin_ref[...], preferred_element_type=jnp.float32)
    logits = logits + bias_ref[...]

    # log_softmax over the vocab axis, all in f32 (v5e has no bf16 VPU/EUP)
    m = jnp.max(logits, axis=-1, keepdims=True)
    shifted = logits - m
    lse = jnp.log(jnp.sum(jnp.exp(shifted), axis=-1, keepdims=True))
    out_ref[...] = (shifted - lse).astype(out_ref.dtype)


def _round_up(x, m):
    return (x + m - 1) // m * m


def _pick_tile_b(batch):
    """Generation-aware batch tile.

    v5e / v6e: one TensorCore -> the grid is a serial loop; one big step (up to 256
    rows, full MXU height) avoids ~0.35us/step overhead.
    v7x: two TensorCores -> keep >= 2 grid steps when the batch allows so the
    "parallel" axis actually shards across cores, preferring 256-row tiles.
    """
    b8 = _round_up(batch, 8)
    kind = jax.devices()[0].device_kind.lower()
    multi_tc = "v7" in kind
    if multi_tc:
        for t in (256, 128):
            if b8 >= 2 * t:
                return t
        return min(128, b8)
    return min(256, b8)


@functools.lru_cache(maxsize=None)
def _get_cbow_call(b_pad, vocab, emb_dim, tile_b):
    """Build (once per shape signature) the pallas_call for the CBOW forward."""
    # VMEM budget derived from the actual blocks (double-buffered) + headroom,
    # capped safely below v7x's 64 MiB physical VMEM.
    ctx_bytes = tile_b * vocab * 4
    out_bytes = tile_b * vocab * 4
    w_bytes = (vocab * emb_dim + emb_dim * vocab + vocab) * 4
    vmem_limit = 2 * (ctx_bytes + out_bytes) + 2 * w_bytes + (4 << 20)
    vmem_limit = min(vmem_limit, 48 << 20)

    # Weight / bias blocks have constant index_maps -> stay resident across the grid.
    def const_spec(shape):
        return pl.BlockSpec(shape, lambda i: (0, 0))

    return pl.pallas_call(
        cbow_kernel,
        out_shape=jax.ShapeDtypeStruct((b_pad, vocab), jnp.float32),
        grid_spec=pltpu.PrefetchScalarGridSpec(
            num_scalar_prefetch=0,
            grid=(b_pad // tile_b,),
            in_specs=[
                pl.BlockSpec((tile_b, vocab), lambda i: (i, 0)),   # context tile
                const_spec((vocab, emb_dim)),                      # W_emb_T, resident
                const_spec((emb_dim, vocab)),                      # W_lin_T, resident
                const_spec((1, vocab)),                            # bias, resident
            ],
            out_specs=pl.BlockSpec((tile_b, vocab), lambda i: (i, 0)),
        ),
        compiler_params=pltpu.CompilerParams(
            dimension_semantics=("parallel",),   # batch tiles shard across TCs on v7x
            vmem_limit_bytes=vmem_limit,
        ),
    )


@functools.partial(jax.jit, static_argnames=("tile_b",))
def _cbow_impl(context, w_emb_t, w_lin_t, b_lin, *, tile_b):
    B, V = context.shape
    E = w_emb_t.shape[1]
    b_pad = _round_up(B, tile_b)

    ctx = context
    if b_pad != B:
        # zero rows; the counts>=1 guard keeps them finite, result is sliced off below
        ctx = jnp.pad(ctx, ((0, b_pad - B), (0, 0)))

    bias2d = b_lin.reshape(1, V)
    out = _get_cbow_call(b_pad, V, E, tile_b)(ctx, w_emb_t, w_lin_t, bias2d)
    return out[:B]


def cbow_forward(context, w_emb_t, w_lin_t, b_lin, *, tile_b=None):
    """context: (B, V) multi-hot (float dtype; values 0/1)
       w_emb_t: (V, E) = embeddings.weight.T   (pre-transposed once at init)
       w_lin_t: (E, V) = linear.weight.T       (pre-transposed once at init)
       b_lin:   (V,)   = linear.bias
    """
    B, V = context.shape
    Vw, E = w_emb_t.shape
    assert Vw == V and w_lin_t.shape == (E, V) and b_lin.shape == (V,)

    if tile_b is None:
        tile_b = _pick_tile_b(B)
    tile_b = min(tile_b, _round_up(B, 8))
    return _cbow_impl(context, w_emb_t, w_lin_t, b_lin, tile_b=tile_b)


def reference_forward(context, w_emb, w_lin, b_lin):
    """Pure-JAX reference matching the PyTorch module (f32 math)."""
    emb = context @ w_emb.T
    counts = context @ jnp.ones((context.shape[1], 1), jnp.float32)
    h = emb / counts
    logits = h @ w_lin.T + b_lin
    return jax.nn.log_softmax(logits, axis=1)


if __name__ == "__main__":
    vocab_size = 256
    embedding_dim = 128
    batch = 256

    key = jax.random.PRNGKey(0)
    k_ctx, k_we, k_wl, k_bl = jax.random.split(key, 4)

    # Deterministic parameter init (shapes follow nn.Linear conventions).
    bound_e = 1.0 / (vocab_size ** 0.5)
    w_emb = jax.random.uniform(k_we, (embedding_dim, vocab_size),
                               jnp.float32, -bound_e, bound_e)      # embeddings.weight
    bound_l = 1.0 / (embedding_dim ** 0.5)
    w_lin = jax.random.uniform(k_wl, (vocab_size, embedding_dim),
                               jnp.float32, -bound_l, bound_l)      # linear.weight
    b_lin = jax.random.uniform(k_bl, (vocab_size,), jnp.float32, -bound_l, bound_l)

    # Multi-hot context: a handful of active tokens per row (>= 1 guaranteed).
    probs = jax.random.uniform(k_ctx, (batch, vocab_size), jnp.float32)
    context = (probs < 0.05).astype(jnp.float32)
    context = context.at[:, 0].set(1.0)

    # One-time layout prep, hoisted out of the per-call path.
    w_emb_t = jnp.asarray(w_emb.T)   # (V, E)
    w_lin_t = jnp.asarray(w_lin.T)   # (E, V)

    out = cbow_forward(context, w_emb_t, w_lin_t, b_lin)
    out = jax.block_until_ready(out)

    ref = reference_forward(context, w_emb, w_lin, b_lin)
    assert out.shape == (batch, vocab_size)
    assert jnp.allclose(out, ref, atol=1e-4, rtol=1e-4), "mismatch vs reference"

    print("KERNEL_OK")
</pallas_src>

<mosaic_0001>
module attributes {stable_mosaic.version = 11 : i64} {
  func.func @cbow_kernel(%arg0: i32, %arg1: memref<256x256xf32, #tpu.memory_space<vmem>>, %arg2: memref<256x128xf32, #tpu.memory_space<vmem>>, %arg3: memref<128x256xf32, #tpu.memory_space<vmem>>, %arg4: memref<1x256xf32, #tpu.memory_space<vmem>>, %arg5: memref<256x256xf32, #tpu.memory_space<vmem>>) attributes {dimension_semantics = [#tpu.dimension_semantics<parallel>], iteration_bounds = array<i64: 1>, scalar_prefetch = 0 : i64, scratch_operands = 0 : i64, tpu.core_type = #tpu.core_type<tc>, window_params = [{transform_indices = @transform_0, window_bounds = array<i64: 256, 256>}, {pipeline_mode = #tpu.pipeline_mode<synchronous>, transform_indices = @transform_1, window_bounds = array<i64: 256, 128>}, {pipeline_mode = #tpu.pipeline_mode<synchronous>, transform_indices = @transform_2, window_bounds = array<i64: 128, 256>}, {pipeline_mode = #tpu.pipeline_mode<synchronous>, transform_indices = @transform_3, window_bounds = array<i64: 1, 256>}, {transform_indices = @transform_4, window_bounds = array<i64: 256, 256>}]} {
    %c0 = arith.constant 0 : index
    %c0_0 = arith.constant 0 : index
    %0 = vector.load %arg1[%c0, %c0_0] : memref<256x256xf32, #tpu.memory_space<vmem>>, vector<256x256xf32>
    %c0_1 = arith.constant 0 : index
    %c0_2 = arith.constant 0 : index
    %1 = vector.load %arg2[%c0_1, %c0_2] : memref<256x128xf32, #tpu.memory_space<vmem>>, vector<256x128xf32>
    %cst = arith.constant dense<0.000000e+00> : vector<256x128xf32>
    %2 = tpu.matmul %0, %1, %cst {dimension_numbers = #tpu.dot_dimension_numbers<[1], [0], [0], [1], [0, 0, 1, 1], [], []>} : vector<256x256xf32>, vector<256x128xf32>, vector<256x128xf32> -> vector<256x128xf32>
    %cst_3 = arith.constant dense<0.000000e+00> : vector<256xf32>
    %3 = vector.multi_reduction <add>, %0, %cst_3 [1] : vector<256x256xf32> to vector<256xf32>
    %4 = vector.shape_cast %3 : vector<256xf32> to vector<256x1xf32>
    %cst_4 = arith.constant 1.000000e+00 : f32
    %5 = vector.broadcast %cst_4 : f32 to vector<256x1xf32>
    %6 = arith.maximumf %4, %5 : vector<256x1xf32>
    %7 = tpu.reciprocal %6 : vector<256x1xf32> -> vector<256x1xf32>
    %8 = vector.broadcast %7 : vector<256x1xf32> to vector<256x128xf32>
    %9 = arith.mulf %2, %8 : vector<256x128xf32>
    %c0_5 = arith.constant 0 : index
    %c0_6 = arith.constant 0 : index
    %10 = vector.load %arg3[%c0_5, %c0_6] : memref<128x256xf32, #tpu.memory_space<vmem>>, vector<128x256xf32>
    %cst_7 = arith.constant dense<0.000000e+00> : vector<256x256xf32>
    %11 = tpu.matmul %9, %10, %cst_7 {dimension_numbers = #tpu.dot_dimension_numbers<[1], [0], [0], [1], [0, 0, 1, 1], [], []>} : vector<256x128xf32>, vector<128x256xf32>, vector<256x256xf32> -> vector<256x256xf32>
    %c0_8 = arith.constant 0 : index
    %c0_9 = arith.constant 0 : index
    %12 = vector.load %arg4[%c0_8, %c0_9] : memref<1x256xf32, #tpu.memory_space<vmem>>, vector<1x256xf32>
    %13 = vector.broadcast %12 : vector<1x256xf32> to vector<256x256xf32>
    %14 = arith.addf %11, %13 : vector<256x256xf32>
    %cst_10 = arith.constant dense<0xFF800000> : vector<256xf32>
    %15 = vector.multi_reduction <maximumf>, %14, %cst_10 [1] : vector<256x256xf32> to vector<256xf32>
    %16 = vector.shape_cast %15 : vector<256xf32> to vector<256x1xf32>
    %17 = vector.broadcast %16 : vector<256x1xf32> to vector<256x256xf32>
    %18 = arith.subf %14, %17 : vector<256x256xf32>
    %19 = math.exp %18 : vector<256x256xf32>
    %cst_11 = arith.constant dense<0.000000e+00> : vector<256xf32>
    %20 = vector.multi_reduction <add>, %19, %cst_11 [1] : vector<256x256xf32> to vector<256xf32>
    %21 = vector.shape_cast %20 : vector<256xf32> to vector<256x1xf32>
    %22 = math.log %21 : vector<256x1xf32>
    %23 = vector.broadcast %22 : vector<256x1xf32> to vector<256x256xf32>
    %24 = arith.subf %18, %23 : vector<256x256xf32>
    %c0_12 = arith.constant 0 : index
    %c0_13 = arith.constant 0 : index
    %25 = vector.load %arg5[%c0_12, %c0_13] : memref<256x256xf32, #tpu.memory_space<vmem>>, vector<256x256xf32>
    tpu.vector_store %arg5[%c0_12, %c0_13], %24 {strides = array<i32>} : memref<256x256xf32, #tpu.memory_space<vmem>>, vector<256x256xf32>,
    return
  }
  func.func @transform_0(%arg0: i32) -> (i32, i32) {
    %c0_i32 = arith.constant 0 : i32
    %c0_i32_0 = arith.constant 0 : i32
    return %arg0, %c0_i32 : i32, i32
  }
  func.func @transform_1(%arg0: i32) -> (i32, i32) {
    %c0_i32 = arith.constant 0 : i32
    %c0_i32_0 = arith.constant 0 : i32
    %c0_i32_1 = arith.constant 0 : i32
    return %c0_i32, %c0_i32_0 : i32, i32
  }
  func.func @transform_2(%arg0: i32) -> (i32, i32) {
    %c0_i32 = arith.constant 0 : i32
    %c0_i32_0 = arith.constant 0 : i32
    %c0_i32_1 = arith.constant 0 : i32
    return %c0_i32, %c0_i32_0 : i32, i32
  }
  func.func @transform_3(%arg0: i32) -> (i32, i32) {
    %c0_i32 = arith.constant 0 : i32
    %c0_i32_0 = arith.constant 0 : i32
    %c0_i32_1 = arith.constant 0 : i32
    return %c0_i32, %c0_i32_0 : i32, i32
  }
  func.func @transform_4(%arg0: i32) -> (i32, i32) {
    %c0_i32 = arith.constant 0 : i32
    %c0_i32_0 = arith.constant 0 : i32
    return %arg0, %c0_i32 : i32, i32
  }
}

</mosaic_0001>

<bundles_post_ra>
// kernel: _cbow_impl.1
= control target key start
LH: loop header
LB: loop body
LE: loop exit
PB: predicated region body
PF: predicated region fallthrough
CT: control target
= control target key end

     0   :  { %9 = vsyncpa [#allocation3], 0  ;;  %s2882_s0 = inlined_call_operand.hbm [shape: f32[256,256], index: 0, kind: input, shape index: {}]   ;;  %s2883_s1 = inlined_call_operand.hbm [shape: f32[256,128], index: 1, kind: input, shape index: {}]   ;;  %s2884_s2 = inlined_call_operand.hbm [shape: f32[128,256], index: 2, kind: input, shape index: {}]   ;;  %s2885_s3 = inlined_call_operand.vmem [shape: f32[1,256], index: 3, kind: input, shape index: {}]   ;;  %s2886_s4 = inlined_call_operand.hbm [shape: f32[256,256], index: 4, kind: output, shape index: {}]  }
   0x1   :  { %10 = vsyncpa [#allocation6], 0 }
   0x2   :  { %11 = vsyncpa [#allocation4], 0  ;;  %s1907_s15 = smov [#allocation5]   ;;  %s1813_s19 = scalar_lea.hbm %s2883_s1, 4096 }
   0x3   :  { %s29_s16 = sshll.u32 %s1907_s15, 4  ;;  %p1814_p0 = scmp.ne.s32.totalorder %s2883_s1, %s1813_s19  ;;  %s30_s16 = int_to_ptr.vmem [resolvable:$true] %s29_s16 }
   0x4   :  { %p1817_p1 = scmp.lt.u32.totalorder %s1813_s19, %s2883_s1 }
   0x6   :  { %p1819_p2 = pnand %p1817_p1, %p1814_p0 }
   0x8   :  { %1822 = shalt.err (!%p1819_p2)
}
   0x9   :  { %s1823_s24 = scalar_lea.vmem %s30_s16, 4096  ;;  %p1828_p4 = scmp.lt.s32.totalorder %s30_s16, %s30_s16 }
   0xa   :  { %p1824_p3 = scmp.ne.s32.totalorder %s30_s16, %s1823_s24  ;;  %p1829_p5 = scmp.lt.s32.totalorder %s1823_s24, %s1823_s24 }
   0xc   :  { %p1830_p6 = por %p1829_p5, %p1828_p4 }
   0xe   :  { %p1831_p7 = pnand %p1830_p6, %p1824_p3 }
  0x10   :  { %1834 = shalt.err (!%p1831_p7)
}
  0x11   :  { %s1908_s25 = smov 128   ;;  %s1909_s26 = smov 8  }
  0x12   :  { %35 = dma.hbm_to_vmem [thread:$0]  %s2883_s1, 4096, %s30_s16, [#allocation6], %s1908_s25, %s1908_s25, %s1909_s26  }
  0x13   :  { %s1910_s29 = smov [#allocation2]   ;;  %s1835_s7 = scalar_lea.hbm %s2882_s0, 8192 }
  0x14   :  { %s17_s30 = sshll.u32 %s1910_s29, 4  ;;  %p1836_p8 = scmp.ne.s32.totalorder %s2882_s0, %s1835_s7  ;;  %s18_s30 = int_to_ptr.vmem [resolvable:$true] %s17_s30 }
  0x15   :  { %p1839_p9 = scmp.lt.u32.totalorder %s1835_s7, %s2882_s0 }
  0x17   :  { %p1841_p10 = pnand %p1839_p9, %p1836_p8 }
  0x19   :  { %1844 = shalt.err (!%p1841_p10)
}
  0x1a   :  { %s1845_s12 = scalar_lea.vmem %s18_s30, 8192  ;;  %p1850_p12 = scmp.lt.s32.totalorder %s18_s30, %s18_s30 }
  0x1b   :  { %p1846_p11 = scmp.ne.s32.totalorder %s18_s30, %s1845_s12  ;;  %p1851_p13 = scmp.lt.s32.totalorder %s1845_s12, %s1845_s12 }
  0x1d   :  { %p1852_p0 = por %p1851_p13, %p1850_p12 }
  0x1f   :  { %p1853_p1 = pnand %p1852_p0, %p1846_p11 }
  0x21   :  { %1856 = shalt.err (!%p1853_p1)
}
  0x22   :  { %s1911_s1 = smov 256   ;;  %s1912_s13 = smov 16  }
  0x23   :  { %23 = dma.hbm_to_vmem [thread:$0]  %s2882_s0, 8192, %s18_s30, [#allocation3], %s1911_s1, %s1911_s1, %s1912_s13  }
  0x24   :  { %s1913_s16 = smov [#allocation7]   ;;  %s1857_s20 = scalar_lea.hbm %s2884_s2, 4096 }
  0x25   :  { %s41_s17 = sshll.u32 %s1913_s16, 4  ;;  %p1858_p2 = scmp.ne.s32.totalorder %s2884_s2, %s1857_s20  ;;  %s42_s17 = int_to_ptr.vmem [resolvable:$true] %s41_s17 }
  0x26   :  { %p1861_p3 = scmp.lt.u32.totalorder %s1857_s20, %s2884_s2 }
  0x28   :  { %p1863_p4 = pnand %p1861_p3, %p1858_p2 }
  0x2a   :  { %1866 = shalt.err (!%p1863_p4)
}
  0x2b   :  { %s1867_s25 = scalar_lea.vmem %s42_s17, 4096  ;;  %p1872_p6 = scmp.lt.s32.totalorder %s42_s17, %s42_s17 }
  0x2c   :  { %p1868_p5 = scmp.ne.s32.totalorder %s42_s17, %s1867_s25  ;;  %p1873_p7 = scmp.lt.s32.totalorder %s1867_s25, %s1867_s25 }
  0x2e   :  { %p1874_p8 = por %p1873_p7, %p1872_p6 }
  0x30   :  { %p1875_p9 = pnand %p1874_p8, %p1868_p5 }
  0x32   :  { %1878 = shalt.err (!%p1875_p9)
}
  0x33   :  { %47 = dma.hbm_to_vmem [thread:$0]  %s2884_s2, 4096, %s42_s17, [#allocation6], %s1911_s1, %s1911_s1, %s1912_s13  }
  0x34   :  { %1901 = dma.done.wait [#allocation3], 8192  }
  0x35   :  { %1902 = vsyncadd [#allocation3], 4294959104 }
  0x36   :  { %1903 = dma.done.wait [#allocation6], 8192  }
  0x37   :  { %1904 = vsyncadd [#allocation6], 4294959104  ;;  %v1914_v0 = vmov 0.0|0.0   ;;  %v123_v1 = vld [vmem:[#allocation5] sm:$0xff]  ;;  %v124_v2 = vld [vmem:[#allocation5 + $0x8] sm:$0xff] }
  0x38   :  { %1467 = vmatprep.subr.bf16.mxu0 %v1914_v0  ;;  %v125_v3 = vld [vmem:[#allocation5 + $0x10] sm:$0xff]  ;;  %v1468_v4 = vpack.c.bf16 %v124_v2, %v123_v1  ;;  %v126_v5 = vld [vmem:[#allocation5 + $0x18] sm:$0xff]  ;;  %v127_v7 = vld [vmem:[#allocation5 + $0x20] sm:$0xff] }
  0x39   :  { %v1471_v6 = vpack.c.bf16 %v126_v5, %v125_v3  ;;  %v128_v8 = vld [vmem:[#allocation5 + $0x28] sm:$0xff]  ;;  %v129_v10 = vld [vmem:[#allocation5 + $0x30] sm:$0xff]  ;;  %v130_v11 = vld [vmem:[#allocation5 + $0x38] sm:$0xff] }
  0x3a   :  { %1469 = vmatpush1.bf16.msra.mxu0 %v1468_v4  ;;  %v1474_v9 = vpack.c.bf16 %v128_v8, %v127_v7  ;;  %v60_v12 = vld [vmem:[#allocation2 + $0x8] sm:$0xff]  ;;  %v1477_v13 = vpack.c.bf16 %v130_v11, %v129_v10  ;;  %v131_v14 = vld [vmem:[#allocation5 + $0x40] sm:$0xff]  ;;  %v1995_v20 = vld [vmem:[#allocation2 + $0x18] sm:$0xff] }
  0x3b   :  { %1470 = vmatprep.subr.bf16.mxu0 %v1914_v0  ;;  %219 = vmatprep.mubr.f32.mxu0 %v60_v12  ;;  %v1987_v15 = vld [vmem:[#allocation2] sm:$0xff]  ;;  %v132_v16 = vld [vmem:[#allocation5 + $0x48] sm:$0xff]  ;;  %v1997_v21 = vld [vmem:[#allocation2 + $0x10] sm:$0xff] }
  0x3c   :  { %v1990_v17 = vld [vmem:[#allocation2 + $0x28] sm:$0xff]  ;;  %v1992_v18 = vld [vmem:[#allocation2 + $0x20] sm:$0xff]  ;;  %v380_v19 = vadd.f32 %v60_v12, %v1987_v15  ;;  %v2001_v23 = vld [vmem:[#allocation2 + $0x38] sm:$0xff]  ;;  %v383_v25 = vadd.f32 %v1995_v20, %v1997_v21  ;;  %v1480_v26 = vpack.c.bf16 %v132_v16, %v131_v14 }
  0x3d   :  { %v386_v22 = vadd.f32 %v1990_v17, %v1992_v18  ;;  %v2003_v24 = vld [vmem:[#allocation2 + $0x30] sm:$0xff]  ;;  %v134_v29 = vld [vmem:[#allocation5 + $0x58] sm:$0xff]  ;;  %v2010_v30 = vld [vmem:[#allocation2 + $0x48] sm:$0xff] }
  0x3e   :  { %1472 = vmatpush1.bf16.msra.mxu0 %v1471_v6  ;;  %381 = vadd.xlane.f32.xlu0 %v380_v19  ;;  %v389_v27 = vadd.f32 %v2001_v23, %v2003_v24  ;;  %v133_v28 = vld [vmem:[#allocation5 + $0x50] sm:$0xff]  ;;  %v2012_v31 = vld [vmem:[#allocation2 + $0x40] sm:$0xff]  ;;  %v2014_v32 = vld [vmem:[#allocation2 + $0x58] sm:$0xff] }
  0x3f   :  { %1473 = vmatprep.subr.bf16.mxu0 %v1914_v0  ;;  %387 = vadd.xlane.f32.xlu1 %v386_v22  ;;  %v2016_v33 = vld [vmem:[#allocation2 + $0x50] sm:$0xff]  ;;  %v392_v34 = vadd.f32 %v2010_v30, %v2012_v31  ;;  %v1483_v35 = vpack.c.bf16 %v134_v29, %v133_v28  ;;  %v135_v37 = vld [vmem:[#allocation5 + $0x60] sm:$0xff]  ;;  %v136_v38 = vld [vmem:[#allocation5 + $0x68] sm:$0xff] }
  0x40   :  { %v395_v36 = vadd.f32 %v2014_v32, %v2016_v33  ;;  %v2023_v39 = vld [vmem:[#allocation2 + $0x68] sm:$0xff]  ;;  %v2025_v40 = vld [vmem:[#allocation2 + $0x60] sm:$0xff]  ;;  %v2027_v41 = vld [vmem:[#allocation2 + $0x78] sm:$0xff]  ;;  %v1486_v44 = vpack.c.bf16 %v136_v38, %v135_v37 }
  0x41   :  { %v2029_v42 = vld [vmem:[#allocation2 + $0x70] sm:$0xff]  ;;  %v398_v43 = vadd.f32 %v2023_v39, %v2025_v40  ;;  %v138_v47 = vld [vmem:[#allocation5 + $0x78] sm:$0xff]  ;;  %v2036_v48 = vld [vmem:[#allocation2 + $0x88] sm:$0xff] }
  0x42   :  { %1475 = vmatpush1.bf16.msra.mxu0 %v1474_v9  ;;  %384 = vadd.xlane.f32.xlu0 %v383_v25  ;;  %v401_v45 = vadd.f32 %v2027_v41, %v2029_v42  ;;  %v137_v46 = vld [vmem:[#allocation5 + $0x70] sm:$0xff]  ;;  %v2038_v49 = vld [vmem:[#allocation2 + $0x80] sm:$0xff]  ;;  %v140_v53 = vld [vmem:[#allocation5 + $0x88] sm:$0xff] }
  0x43   :  { %1476 = vmatprep.subr.bf16.mxu0 %v1914_v0  ;;  %390 = vadd.xlane.f32.xlu1 %v389_v27  ;;  %v404_v50 = vadd.f32 %v2036_v48, %v2038_v49  ;;  %v1489_v51 = vpack.c.bf16 %v138_v47, %v137_v46  ;;  %v139_v52 = vld [vmem:[#allocation5 + $0x80] sm:$0xff]  ;;  %v2043_v54 = vld [vmem:[#allocation2 + $0x98] sm:$0xff]  ;;  %v2045_v55 = vld [vmem:[#allocation2 + $0x90] sm:$0xff] }
  0x44   :  { %v407_v56 = vadd.f32 %v2043_v54, %v2045_v55  ;;  %v1492_v57 = vpack.c.bf16 %v140_v53, %v139_v52  ;;  %v141_v58 = vld [vmem:[#allocation5 + $0x90] sm:$0xff]  ;;  %v142_v59 = vld [vmem:[#allocation5 + $0x98] sm:$0xff]  ;;  %v2050_v60 = vld [vmem:[#allocation2 + $0xa8] sm:$0xff] }
  0x45   :  { %v2052_v61 = vld [vmem:[#allocation2 + $0xa0] sm:$0xff]  ;;  %v1495_v63 = vpack.c.bf16 %v142_v59, %v141_v58  ;;  %v144_v2 = vld [vmem:[#allocation5 + $0xa8] sm:$0xff]  ;;  %v2057_v3 = vld [vmem:[#allocation2 + $0xb8] sm:$0xff] }
  0x46   :  { %1478 = vmatpush1.bf16.msra.mxu0 %v1477_v13  ;;  %393 = vadd.xlane.f32.xlu0 %v392_v34  ;;  %v410_v62 = vadd.f32 %v2050_v60, %v2052_v61  ;;  %v143_v1 = vld [vmem:[#allocation5 + $0xa0] sm:$0xff]  ;;  %v2059_v4 = vld [vmem:[#allocation2 + $0xb0] sm:$0xff]  ;;  %v146_v8 = vld [vmem:[#allocation5 + $0xb8] sm:$0xff] }
  0x47   :  { %1479 = vmatprep.subr.bf16.mxu0 %v1914_v0  ;;  %396 = vadd.xlane.f32.xlu1 %v395_v36  ;;  %v413_v5 = vadd.f32 %v2057_v3, %v2059_v4  ;;  %v1498_v6 = vpack.c.bf16 %v144_v2, %v143_v1  ;;  %v145_v7 = vld [vmem:[#allocation5 + $0xb0] sm:$0xff]  ;;  %v2064_v9 = vld [vmem:[#allocation2 + $0xc8] sm:$0xff]  ;;  %v2066_v10 = vld [vmem:[#allocation2 + $0xc0] sm:$0xff] }
  0x48   :  { %v416_v11 = vadd.f32 %v2064_v9, %v2066_v10  ;;  %v1501_v12 = vpack.c.bf16 %v146_v8, %v145_v7  ;;  %v147_v13 = vld [vmem:[#allocation5 + $0xc0] sm:$0xff]  ;;  %v148_v14 = vld [vmem:[#allocation5 + $0xc8] sm:$0xff]  ;;  %v2071_v16 = vld [vmem:[#allocation2 + $0xd8] sm:$0xff] }
  0x49   :  { %v2073_v19 = vld [vmem:[#allocation2 + $0xd0] sm:$0xff]  ;;  %v1504_v25 = vpack.c.bf16 %v148_v14, %v147_v13  ;;  %v150_v27 = vld [vmem:[#allocation5 + $0xd8] sm:$0xff]  ;;  %v2078_v28 = vld [vmem:[#allocation2 + $0xe8] sm:$0xff] }
  0x4a   :  { %1481 = vmatpush1.bf16.msra.mxu0 %v1480_v26  ;;  %399 = vadd.xlane.f32.xlu0 %v398_v43  ;;  %v419_v22 = vadd.f32 %v2071_v16, %v2073_v19  ;;  %v149_v26 = vld [vmem:[#allocation5 + $0xd0] sm:$0xff]  ;;  %v2080_v29 = vld [vmem:[#allocation2 + $0xe0] sm:$0xff]  ;;  %v152_v37 = vld [vmem:[#allocation5 + $0xe8] sm:$0xff] }
  0x4b   :  { %1482 = vmatprep.subr.bf16.mxu0 %v1914_v0  ;;  %402 = vadd.xlane.f32.xlu1 %v401_v45  ;;  %v422_v34 = vadd.f32 %v2078_v28, %v2080_v29  ;;  %v151_v36 = vld [vmem:[#allocation5 + $0xe0] sm:$0xff]  ;;  %v2085_v38 = vld [vmem:[#allocation2 + $0xf8] sm:$0xff]  ;;  %v2087_v43 = vld [vmem:[#allocation2 + $0xf0] sm:$0xff] }
  0x4c   :  { %v1510_v45 = vpack.c.bf16 %v152_v37, %v151_v36  ;;  %v153_v46 = vld [vmem:[#allocation5 + $0xf0] sm:$0xff]  ;;  %v154_v47 = vld [vmem:[#allocation5 + $0xf8] sm:$0xff]  ;;  %v2103_v58 = vld [vmem:[#allocation2 + $0x128] sm:$0xff] }
  0x4d   :  { %v1513_v53 = vpack.c.bf16 %v154_v47, %v153_v46  ;;  %v2105_v59 = vld [vmem:[#allocation2 + $0x120] sm:$0xff]  ;;  %v2111_v1 = vld [vmem:[#allocation2 + $0x148] sm:$0xff]  ;;  %v579_v14 = vld [vmem:[#allocation7 + $0x38] sm:$0xff] }
  0x4e   :  { %1484 = vmatpush1.bf16.msra.mxu0 %v1483_v35  ;;  %405 = vadd.xlane.f32.xlu0 %v404_v50  ;;  %v1507_v35 = vpack.c.bf16 %v150_v27, %v149_v26  ;;  %v2092_v50 = vld [vmem:[#allocation2 + $0x108] sm:$0xff]  ;;  %v2113_v2 = vld [vmem:[#allocation2 + $0x140] sm:$0xff]  ;;  %v2125_v26 = vld [vmem:[#allocation2 + $0x150] sm:$0xff] }
  0x4f   :  { %1485 = vmatprep.subr.bf16.mxu0 %v1914_v0  ;;  %408 = vadd.xlane.f32.xlu1 %v407_v56  ;;  %v2098_v56 = vld [vmem:[#allocation2 + $0x118] sm:$0xff]  ;;  %v573_v7 = vld [vmem:[#allocation7 + $0x8] sm:$0xff]  ;;  %v572_v8 = vld [vmem:[#allocation7] sm:$0xff] }
  0x50   :  { %v577_v13 = vld [vmem:[#allocation7 + $0x28] sm:$0xff]  ;;  %v576_v37 = vld [vmem:[#allocation7 + $0x20] sm:$0xff] }
  0x51   :  { %v1519_v36 = vpack.c.bf16 %v579_v14, %v577_v13  ;;  %v581_v47 = vld [vmem:[#allocation7 + $0x48] sm:$0xff]  ;;  %v587_v14 = vld [vmem:[#allocation7 + $0x78] sm:$0xff] }
  0x52   :  { %1487 = vmatpush1.bf16.msra.mxu0 %v1486_v44  ;;  %411 = vadd.xlane.f32.xlu0 %v410_v62  ;;  %v425_v44 = vadd.f32 %v2085_v38, %v2087_v43  ;;  %v2107_v62 = vld [vmem:[#allocation2 + $0x138] sm:$0xff]  ;;  %v585_v13 = vld [vmem:[#allocation7 + $0x68] sm:$0xff] }
  0x53   :  { %1488 = vmatprep.subr.bf16.mxu0 %v1914_v0  ;;  %414 = vadd.xlane.f32.xlu1 %v413_v5 }
  0x56   :  { %1490 = vmatpush1.bf16.msra.mxu0 %v1489_v51  ;;  %417 = vadd.xlane.f32.xlu0 %v416_v11  ;;  %v2094_v51 = vld [vmem:[#allocation2 + $0x100] sm:$0xff] }
  0x57   :  { %1491 = vmatprep.subr.bf16.mxu0 %v1914_v0  ;;  %420 = vadd.xlane.f32.xlu1 %v419_v22  ;;  %v428_v52 = vadd.f32 %v2092_v50, %v2094_v51  ;;  %v440_v22 = vadd.f32 %v2111_v1, %v2113_v2 }
  0x5a   :  { %1493 = vmatpush1.bf16.msra.mxu0 %v1492_v57  ;;  %423 = vadd.xlane.f32.xlu0 %v422_v34  ;;  %v2100_v57 = vld [vmem:[#allocation2 + $0x110] sm:$0xff]  ;;  %v2128_v34 = vld [vmem:[#allocation2 + $0x168] sm:$0xff] }
  0x5b   :  { %1494 = vmatprep.subr.bf16.mxu0 %v1914_v0  ;;  %426 = vadd.xlane.f32.xlu1 %v425_v44  ;;  %v431_v5 = vadd.f32 %v2098_v56, %v2100_v57  ;;  %v578_v44 = vld [vmem:[#allocation7 + $0x30] sm:$0xff] }
  0x5e   :  { %1496 = vmatpush1.bf16.msra.mxu0 %v1495_v63  ;;  %429 = vadd.xlane.f32.xlu0 %v428_v52  ;;  %v2109_v63 = vld [vmem:[#allocation2 + $0x130] sm:$0xff]  ;;  %v583_v52 = vld [vmem:[#allocation7 + $0x58] sm:$0xff] }
  0x5f   :  { %1497 = vmatprep.subr.bf16.mxu0 %v1914_v0  ;;  %432 = vadd.xlane.f32.xlu1 %v431_v5  ;;  %v437_v11 = vadd.f32 %v2107_v62, %v2109_v63  ;;  %v2139_v5 = vld [vmem:[#allocation2 + $0x170] sm:$0xff] }
  0x62   :  { %1499 = vmatpush1.bf16.msra.mxu0 %v1498_v6  ;;  %v434_v6 = vadd.f32 %v2103_v58, %v2105_v59 }
  0x63   :  { %1500 = vmatprep.subr.bf16.mxu0 %v1914_v0  ;;  %438 = vadd.xlane.f32.xlu1 %v437_v11  ;;  %v2145_v11 = vld [vmem:[#allocation2 + $0x180] sm:$0xff] }
  0x64   :  { %435 = vadd.xlane.f32.xlu0 %v434_v6  ;;  %v1521_v6 = vpack.c.bf16 %v578_v44, %v576_v37  ;;  %v584_v37 = vld [vmem:[#allocation7 + $0x60] sm:$0xff]  ;;  %v586_v44 = vld [vmem:[#allocation7 + $0x70] sm:$0xff] }
  0x66   :  { %1502 = vmatpush1.bf16.msra.mxu0 %v1501_v12  ;;  %v574_v12 = vld [vmem:[#allocation7 + $0x10] sm:$0xff] }
  0x67   :  { %1503 = vmatprep.subr.bf16.mxu0 %v1914_v0 }
  0x68   :  { %441 = vadd.xlane.f32.xlu0 %v440_v22  ;;  %v2151_v22 = vld [vmem:[#allocation2 + $0x198] sm:$0xff] }
  0x6a   :  { %1505 = vmatpush1.bf16.msra.mxu0 %v1504_v25  ;;  %v2123_v25 = vld [vmem:[#allocation2 + $0x158] sm:$0xff] }
  0x6b   :  { %1506 = vmatprep.subr.bf16.mxu0 %v1914_v0  ;;  %v443_v46 = vadd.f32 %v2123_v25, %v2125_v26 }
  0x6d   :  { %444 = vadd.xlane.f32.xlu1 %v443_v46  ;;  %v2159_v46 = vld [vmem:[#allocation2 + $0x1a0] sm:$0xff] }
  0x6e   :  { %1508 = vmatpush1.bf16.msra.mxu0 %v1507_v35  ;;  %v1517_v35 = vpack.c.bf16 %v574_v12, %v572_v8  ;;  %v582_v8 = vld [vmem:[#allocation7 + $0x50] sm:$0xff]  ;;  %2918 = vst [vmem:[#allocation13_spill] sm:$0xff] %v2159_v46 }
  0x6f   :  { %1509 = vmatprep.subr.bf16.mxu0 %v1914_v0 }
  0x72   :  { %1511 = vmatpush1.bf16.msra.mxu0 %v1510_v45  ;;  %v2131_v45 = vld [vmem:[#allocation2 + $0x160] sm:$0xff] }
  0x73   :  { %1512 = vmatprep.subr.bf16.mxu0 %v1914_v0  ;;  %v575_v0 = vld [vmem:[#allocation7 + $0x18] sm:$0xff] }
  0x74   :  { %v1515_v27 = vpack.c.bf16 %v575_v0, %v573_v7  ;;  %v1523_v7 = vpack.c.bf16 %v583_v52, %v581_v47  ;;  %v580_v0 = vld [vmem:[#allocation7 + $0x40] sm:$0xff]  ;;  %v589_v52 = vld [vmem:[#allocation7 + $0x88] sm:$0xff] }
  0x76   :  { %1514 = vmatpush1.bf16.msra.mxu0 %v1513_v53  ;;  %1516 = vmatprep.subr.bf16.mxu1 %v1515_v27  ;;  %v2137_v53 = vld [vmem:[#allocation2 + $0x178] sm:$0xff]  ;;  %v2153_v27 = vld [vmem:[#allocation2 + $0x190] sm:$0xff] }
  0x77   :  { %1518 = vmatpush1.bf16.msra.mxu1 %v1517_v35  ;;  %v449_v12 = vadd.f32 %v2137_v53, %v2139_v5  ;;  %v1525_v35 = vpack.c.bf16 %v582_v8, %v580_v0  ;;  %v455_v47 = vadd.f32 %v2151_v22, %v2153_v27  ;;  %v1529_v0 = vpack.c.bf16 %v586_v44, %v584_v37 }
  0x78   :  { %1520 = vmatprep.subr.bf16.mxu1 %v1519_v36  ;;  %v1527_v36 = vpack.c.bf16 %v587_v14, %v585_v13  ;;  %v590_v13 = vld [vmem:[#allocation7 + $0x90] sm:$0xff]  ;;  %v2173_v14 = vld [vmem:[#allocation2 + $0x1c0] sm:$0xff] }
  0x79   :  { %220 = vmatmul.mubr.f32.vlgmr.msra.gmra.mrb[0].mxu0 %v1987_v15  ;;  %v446_v15 = vadd.f32 %v2128_v34, %v2131_v45  ;;  %450 = vadd.xlane.f32.xlu1 %v449_v12  ;;  %v588_v12 = vld [vmem:[#allocation7 + $0x80] sm:$0xff]  ;;  %2920 = vst [vmem:[#allocation15_spill] sm:$0xff] %v2173_v14 }
  0x7a   :  { %224 = vmatprep.mubr.f32.mxu0 %v1995_v20  ;;  %v2142_v20 = vld [vmem:[#allocation2 + $0x188] sm:$0xff]  ;;  %v1533_v37 = vpack.c.bf16 %v590_v13, %v588_v12  ;;  %v598_v12 = vld [vmem:[#allocation7 + $0xd0] sm:$0xff] }
  0x7b   :  { %447 = vadd.xlane.f32.xlu0 %v446_v15  ;;  %1522 = vmatpush1.bf16.msra.mxu1 %v1521_v6  ;;  %v591_v15 = vld [vmem:[#allocation7 + $0x98] sm:$0xff] }
  0x7c   :  { %1524 = vmatprep.subr.bf16.mxu1 %v1523_v7  ;;  %v2165_v6 = vld [vmem:[#allocation2 + $0x1b8] sm:$0xff]  ;;  %v2167_v7 = vld [vmem:[#allocation2 + $0x1b0] sm:$0xff]  ;;  %v1531_v8 = vpack.c.bf16 %v591_v15, %v589_v52  ;;  %v2187_v15 = vld [vmem:[#allocation2 + $0x1e0] sm:$0xff] }
  0x7d   :  { %225 = vmatmul.mubr.f32.gmra.mrb[2].mxu0 %v1997_v21  ;;  %v452_v21 = vadd.f32 %v2142_v20, %v2145_v11  ;;  %456 = vadd.xlane.f32.xlu1 %v455_v47  ;;  %v592_v47 = vld [vmem:[#allocation7 + $0xa0] sm:$0xff]  ;;  %v594_v52 = vld [vmem:[#allocation7 + $0xb0] sm:$0xff] }
  0x7e   :  { %229 = vmatprep.mubr.f32.mxu0 %v1990_v17  ;;  %v2156_v17 = vld [vmem:[#allocation2 + $0x1a8] sm:$0xff] }
  0x7f   :  { %2917 = vst [vmem:[#allocation12_spill] sm:$0xff] %v2156_v17  ;;  %453 = vadd.xlane.f32.xlu0 %v452_v21  ;;  %1526 = vmatpush1.bf16.msra.mxu1 %v1525_v35  ;;  %v461_v21 = vadd.f32 %v2165_v6, %v2167_v7  ;;  %v2179_v35 = vld [vmem:[#allocation2 + $0x1d8] sm:$0xff] }
  0x80   :  { %1528 = vmatprep.subr.bf16.mxu1 %v1527_v36  ;;  %v2181_v36 = vld [vmem:[#allocation2 + $0x1d0] sm:$0xff] }
  0x81   :  { %230 = vmatmul.mubr.f32.gmra.mrb[4].mxu0 %v1992_v18  ;;  %v458_v18 = vadd.f32 %v2156_v17, %v2159_v46  ;;  %v593_v46 = vld [vmem:[#allocation7 + $0xa8] sm:$0xff]  ;;  %v595_v17 = vld [vmem:[#allocation7 + $0xb8] sm:$0xff]  ;;  %462 = vadd.xlane.f32.xlu1 %v461_v21 }
  0x82   :  { %234 = vmatprep.mubr.f32.mxu0 %v2001_v23  ;;  %v2170_v23 = vld [vmem:[#allocation2 + $0x1c8] sm:$0xff]  ;;  %v1535_v44 = vpack.c.bf16 %v595_v17, %v593_v46  ;;  %v1537_v17 = vpack.c.bf16 %v594_v52, %v592_v47  ;;  %v2196_v46 = vld [vmem:[#allocation2 + $0x1f0] sm:$0xff] }
  0x83   :  { %2919 = vst [vmem:[#allocation14_spill] sm:$0xff] %v2170_v23  ;;  %459 = vadd.xlane.f32.xlu0 %v458_v18  ;;  %1530 = vmatpush1.bf16.msra.mxu1 %v1529_v0  ;;  %v467_v18 = vadd.f32 %v2179_v35, %v2181_v36  ;;  %v2193_v0 = vld [vmem:[#allocation2 + $0x1f8] sm:$0xff]  ;;  %v601_v21 = vld [vmem:[#allocation7 + $0xe8] sm:$0xff] }
  0x84   :  { %1532 = vmatprep.subr.bf16.mxu1 %v1531_v8  ;;  %v596_v8 = vld [vmem:[#allocation7 + $0xc0] sm:$0xff]  ;;  %v473_v13 = vadd.f32 %v2193_v0, %v2196_v46 }
  0x85   :  { %235 = vmatmul.mubr.f32.gmra.mrb[6].mxu0 %v2003_v24  ;;  %v464_v24 = vadd.f32 %v2170_v23, %v2173_v14  ;;  %v597_v14 = vld [vmem:[#allocation7 + $0xc8] sm:$0xff]  ;;  %v599_v23 = vld [vmem:[#allocation7 + $0xd8] sm:$0xff]  ;;  %468 = vadd.xlane.f32.xlu1 %v467_v18 }
  0x86   :  { %239 = vmatprep.mubr.f32.mxu0 %v2010_v30  ;;  %v2184_v30 = vld [vmem:[#allocation2 + $0x1e8] sm:$0xff] }
  0x87   :  { %465 = vadd.xlane.f32.xlu0 %v464_v24  ;;  %1534 = vmatpush1.bf16.msra.mxu1 %v1533_v37  ;;  %v603_v24 = vld [vmem:[#allocation7 + $0xf8] sm:$0xff]  ;;  %v1541_v37 = vpack.c.bf16 %v598_v12, %v596_v8 }
  0x88   :  { %1536 = vmatprep.subr.bf16.mxu1 %v1535_v44 }
  0x89   :  { %240 = vmatmul.mubr.f32.gmra.mrb[8].mxu0 %v2012_v31  ;;  %v470_v31 = vadd.f32 %v2184_v30, %v2187_v15  ;;  %474 = vadd.xlane.f32.xlu1 %v473_v13 }
  0x8a   :  { %244 = vmatprep.mubr.f32.mxu0 %v2014_v32  ;;  %v1539_v32 = vpack.c.bf16 %v599_v23, %v597_v14 }
  0x8b   :  { %471 = vadd.xlane.f32.xlu0 %v470_v31  ;;  %1538 = vmatpush1.bf16.msra.mxu1 %v1537_v17 }
  0x8c   :  { %1540 = vmatprep.subr.bf16.mxu1 %v1539_v32 }
  0x8d   :  { %245 = vmatmul.mubr.f32.gmra.mrb[10].mxu0 %v2016_v33  ;;  %v1543_v33 = vpack.c.bf16 %v603_v24, %v601_v21 }
  0x8e   :  { %249 = vmatprep.mubr.f32.mxu0 %v2023_v39  ;;  %v600_v39 = vld [vmem:[#allocation7 + $0xe0] sm:$0xff] }
  0x8f   :  { %1542 = vmatpush1.bf16.msra.mxu1 %v1541_v37 }
  0x90   :  { %1544 = vmatprep.subr.bf16.mxu1 %v1543_v33 }
  0x91   :  { %250 = vmatmul.mubr.f32.gmra.mrb[12].mxu0 %v2025_v40  ;;  %v602_v40 = vld [vmem:[#allocation7 + $0xf0] sm:$0xff] }
  0x92   :  { %254 = vmatprep.mubr.f32.mxu0 %v2027_v41  ;;  %v1545_v41 = vpack.c.bf16 %v602_v40, %v600_v39 }
  0x94   :  { %1546 = vmatpush1.bf16.msra.mxu1 %v1545_v41 }
  0x95   :  { %255 = vmatmul.mubr.f32.gmra.mrb[14].mxu0 %v2029_v42  ;;  %v1915_v42 = vmov 0.0  }
  0x96   :  { %259 = vmatprep.mubr.f32.mxu0 %v2036_v48  ;;  %680 = vmatprep.mubr.f32.mxu1 %v1915_v42  ;;  %v2921_v48 = vld [vmem:[#allocation12_spill] sm:$0xff] }
  0x99   :  { %260 = vmatmul.mubr.f32.gmra.mrb[16].mxu0 %v2038_v49  ;;  %v2922_v49 = vld [vmem:[#allocation13_spill] sm:$0xff] }
  0x9a   :  { %264 = vmatprep.mubr.f32.mxu0 %v2043_v54  ;;  %v2923_v54 = vld [vmem:[#allocation14_spill] sm:$0xff] }
  0x9d   :  { %265 = vmatmul.mubr.f32.gmra.mrb[18].mxu0 %v2045_v55  ;;  %v2924_v55 = vld [vmem:[#allocation15_spill] sm:$0xff] }
  0x9e   :  { %269 = vmatprep.mubr.f32.mxu0 %v2050_v60 }
  0xa1   :  { %270 = vmatmul.mubr.f32.gmra.mrb[20].mxu0 %v2052_v61 }
  0xa2   :  { %274 = vmatprep.mubr.f32.mxu0 %v2057_v3 }
  0xa5   :  { %275 = vmatmul.mubr.f32.gmra.mrb[22].mxu0 %v2059_v4 }
  0xa6   :  { %279 = vmatprep.mubr.f32.mxu0 %v2064_v9 }
  0xa9   :  { %280 = vmatmul.mubr.f32.gmra.mrb[24].mxu0 %v2066_v10 }
  0xaa   :  { %284 = vmatprep.mubr.f32.mxu0 %v2071_v16 }
  0xad   :  { %285 = vmatmul.mubr.f32.gmra.mrb[26].mxu0 %v2073_v19 }
  0xae   :  { %289 = vmatprep.mubr.f32.mxu0 %v2078_v28 }
  0xb1   :  { %290 = vmatmul.mubr.f32.gmra.mrb[28].mxu0 %v2080_v29 }
  0xb2   :  { %294 = vmatprep.mubr.f32.mxu0 %v2085_v38 }
  0xb5   :  { %295 = vmatmul.mubr.f32.gmra.mrb[30].mxu0 %v2087_v43 }
  0xb6   :  { %299 = vmatprep.mubr.f32.mxu0 %v2092_v50 }
  0xb9   :  { %300 = vmatmul.mubr.f32.gmra.mrb[32].mxu0 %v2094_v51 }
  0xba   :  { %304 = vmatprep.mubr.f32.mxu0 %v2098_v56 }
  0xbd   :  { %305 = vmatmul.mubr.f32.gmra.mrb[34].mxu0 %v2100_v57 }
  0xbe   :  { %309 = vmatprep.mubr.f32.mxu0 %v2103_v58 }
  0xc1   :  { %310 = vmatmul.mubr.f32.gmra.mrb[36].mxu0 %v2105_v59 }
  0xc2   :  { %314 = vmatprep.mubr.f32.mxu0 %v2107_v62 }
  0xc5   :  { %315 = vmatmul.mubr.f32.gmra.mrb[38].mxu0 %v2109_v63 }
  0xc6   :  { %319 = vmatprep.mubr.f32.mxu0 %v2111_v1 }
  0xc9   :  { %320 = vmatmul.mubr.f32.gmra.mrb[40].mxu0 %v2113_v2 }
  0xca   :  { %324 = vmatprep.mubr.f32.mxu0 %v2123_v25 }
  0xcb   :  { %v382_v60 = vpop.xlane.xlu0 %381 }
  0xcc   :  { %v476_v61 = vmax.f32 %v382_v60, 1.0  ;;  %v388_v4 = vpop.xlane.xlu1 %387 }
  0xcd   :  { %325 = vmatmul.mubr.f32.gmra.mrb[42].mxu0 %v2125_v26  ;;  %v478_v10 = vmax.f32 %v388_v4, 1.0 }
  0xce   :  { %329 = vmatprep.mubr.f32.mxu0 %v2128_v34  ;;  %1557 = vrcp.f32 %v476_v61 }
  0xcf   :  { %v385_v3 = vpop.xlane.xlu0 %384 }
  0xd0   :  { %v477_v9 = vmax.f32 %v385_v3, 1.0  ;;  %v391_v16 = vpop.xlane.xlu1 %390 }
  0xd1   :  { %330 = vmatmul.mubr.f32.gmra.mrb[44].mxu0 %v2131_v45  ;;  %v479_v19 = vmax.f32 %v391_v16, 1.0 }
  0xd2   :  { %334 = vmatprep.mubr.f32.mxu0 %v2137_v53  ;;  %1559 = vrcp.f32 %v477_v9 }
  0xd3   :  { %1561 = vrcp.f32 %v478_v10  ;;  %v394_v28 = vpop.xlane.xlu0 %393 }
  0xd4   :  { %1563 = vrcp.f32 %v479_v19  ;;  %v480_v43 = vmax.f32 %v394_v28, 1.0  ;;  %v397_v56 = vpop.xlane.xlu1 %396 }
  0xd5   :  { %335 = vmatmul.mubr.f32.gmra.mrb[46].mxu0 %v2139_v5  ;;  %v481_v59 = vmax.f32 %v397_v56, 1.0 }
  0xd6   :  { %339 = vmatprep.mubr.f32.mxu0 %v2142_v20  ;;  %1565 = vrcp.f32 %v480_v43 }
  0xd7   :  { %v400_v1 = vpop.xlane.xlu0 %399  ;;  %1567 = vrcp.f32 %v481_v59 }
  0xd8   :  { %v1558_v29 = vpop.eup %1557  ;;  %v482_v26 = vmax.f32 %v400_v1, 1.0  ;;  %v403_v53 = vpop.xlane.xlu1 %402 }
  0xd9   :  { %340 = vmatmul.mubr.f32.gmra.mrb[48].mxu0 %v2145_v11  ;;  %v483_v11 = vmax.f32 %v403_v53, 1.0 }
  0xda   :  { %344 = vmatprep.mubr.f32.mxu0 %v2151_v22  ;;  %1569 = vrcp.f32 %v482_v26 }
  0xdb   :  { %1571 = vrcp.f32 %v483_v11 }
  0xdc   :  { %v1560_v57 = vpop.eup %1559 }
  0xdd   :  { %345 = vmatmul.mubr.f32.gmra.mrb[50].mxu0 %v2153_v27  ;;  %v1562_v2 = vpop.eup %1561 }
  0xde   :  { %349 = vmatprep.mubr.f32.mxu0 %v2921_v48  ;;  %v1564_v5 = vpop.eup %1563 }
  0xe1   :  { %350 = vmatmul.mubr.f32.gmra.mrb[52].mxu0 %v2922_v49 }
  0xe2   :  { %354 = vmatprep.mubr.f32.mxu0 %v2165_v6  ;;  %v406_v6 = vpop.xlane.xlu0 %405 }
  0xe3   :  { %v484_v14 = vmax.f32 %v406_v6, 1.0 }
  0xe5   :  { %355 = vmatmul.mubr.f32.gmra.mrb[54].mxu0 %v2167_v7  ;;  %v1566_v7 = vpop.eup %1565  ;;  %1573 = vrcp.f32 %v484_v14 }
  0xe6   :  { %359 = vmatprep.mubr.f32.mxu0 %v2923_v54  ;;  %v1568_v44 = vpop.eup %1567  ;;  %v412_v31 = vpop.xlane.xlu0 %411 }
  0xe9   :  { %360 = vmatmul.mubr.f32.gmra.mrb[56].mxu0 %v2924_v55 }
  0xea   :  { %364 = vmatprep.mubr.f32.mxu0 %v2179_v35  ;;  %v418_v39 = vpop.xlane.xlu0 %417 }
  0xeb   :  { %v488_v48 = vmax.f32 %v418_v39, 1.0 }
  0xed   :  { %365 = vmatmul.mubr.f32.gmra.mrb[58].mxu0 %v2181_v36 }
  0xee   :  { %369 = vmatprep.mubr.f32.mxu0 %v2184_v30  ;;  %v409_v30 = vpop.xlane.xlu1 %408  ;;  %v424_v10 = vpop.xlane.xlu0 %423 }
  0xef   :  { %v485_v52 = vmax.f32 %v409_v30, 1.0  ;;  %v490_v28 = vmax.f32 %v424_v10, 1.0 }
  0xf1   :  { %370 = vmatmul.mubr.f32.gmra.mrb[60].mxu0 %v2187_v15  ;;  %1575 = vrcp.f32 %v485_v52 }
  0xf2   :  { %374 = vmatprep.mubr.f32.mxu0 %v2193_v0  ;;  %v1570_v0 = vpop.eup %1569  ;;  %v415_v12 = vpop.xlane.xlu1 %414 }
  0xf3   :  { %v1572_v13 = vpop.eup %1571  ;;  %v487_v24 = vmax.f32 %v415_v12, 1.0  ;;  %v430_v59 = vpop.xlane.xlu0 %429 }
  0xf4   :  { %v1574_v40 = vpop.eup %1573  ;;  %v492_v1 = vmax.f32 %v430_v59, 1.0 }
  0xf5   :  { %375 = vmatmul.mubr.f32.gmra.mrb[62].mxu0 %v2196_v46  ;;  %v486_v46 = vmax.f32 %v412_v31, 1.0 }
  0xf6   :  { %v421_v55 = vpop.xlane.xlu1 %420 }
  0xf7   :  { %1577 = vrcp.f32 %v486_v46  ;;  %v489_v3 = vmax.f32 %v421_v55, 1.0  ;;  %v436_v11 = vpop.xlane.xlu0 %435 }
  0xf8   :  { %1579 = vrcp.f32 %v487_v24  ;;  %v494_v6 = vmax.f32 %v436_v11, 1.0 }
  0xf9   :  { %1581 = vrcp.f32 %v488_v48 }
  0xfa   :  { %1583 = vrcp.f32 %v489_v3  ;;  %v427_v43 = vpop.xlane.xlu1 %426 }
  0xfb   :  { %v1576_v60 = vpop.eup %1575  ;;  %1585 = vrcp.f32 %v490_v28  ;;  %v491_v56 = vmax.f32 %v427_v43, 1.0  ;;  %v442_v52 = vpop.xlane.xlu0 %441 }
  0xfc   :  { %v496_v31 = vmax.f32 %v442_v52, 1.0 }
  0xfd   :  { %1587 = vrcp.f32 %v491_v56 }
  0xfe   :  { %v433_v26 = vpop.xlane.xlu1 %432  ;;  %1589 = vrcp.f32 %v492_v1 }
  0xff   :  { %v493_v53 = vmax.f32 %v433_v26, 1.0 }
 0x101   :  { %v1578_v16 = vpop.eup %1577  ;;  %1591 = vrcp.f32 %v493_v53 }
 0x102   :  { %v439_v14 = vpop.xlane.xlu1 %438  ;;  %1593 = vrcp.f32 %v494_v6 }
 0x103   :  { %v495_v30 = vmax.f32 %v439_v14, 1.0 }
 0x105   :  { %1595 = vrcp.f32 %v495_v30 }
 0x106   :  { %v445_v46 = vpop.xlane.xlu1 %444  ;;  %1597 = vrcp.f32 %v496_v31 }
 0x107   :  { %v497_v12 = vmax.f32 %v445_v46, 1.0 }
 0x108   :  { %v448_v24 = vpop.xlane.xlu0 %447 }
 0x109   :  { %1599 = vrcp.f32 %v497_v12  ;;  %v498_v39 = vmax.f32 %v448_v24, 1.0 }
 0x10a   :  { %v451_v48 = vpop.xlane.xlu1 %450 }
 0x10b   :  { %1601 = vrcp.f32 %v498_v39  ;;  %v499_v55 = vmax.f32 %v451_v48, 1.0 }
 0x10c   :  { %v454_v3 = vpop.xlane.xlu0 %453 }
 0x10d   :  { %1603 = vrcp.f32 %v499_v55  ;;  %v500_v10 = vmax.f32 %v454_v3, 1.0 }
 0x10e   :  { %v457_v28 = vpop.xlane.xlu1 %456 }
 0x10f   :  { %1605 = vrcp.f32 %v500_v10  ;;  %v501_v43 = vmax.f32 %v457_v28, 1.0 }
 0x110   :  { %v460_v56 = vpop.xlane.xlu0 %459 }
 0x111   :  { %1607 = vrcp.f32 %v501_v43  ;;  %v502_v59 = vmax.f32 %v460_v56, 1.0 }
 0x112   :  { %v463_v1 = vpop.xlane.xlu1 %462 }
 0x113   :  { %1609 = vrcp.f32 %v502_v59  ;;  %v503_v26 = vmax.f32 %v463_v1, 1.0 }
 0x114   :  { %v466_v53 = vpop.xlane.xlu0 %465 }
 0x115   :  { %v504_v11 = vmax.f32 %v466_v53, 1.0 }
 0x116   :  { %v469_v6 = vpop.xlane.xlu1 %468 }
 0x117   :  { %v505_v14 = vmax.f32 %v469_v6, 1.0 }
 0x118   :  { %v472_v30 = vpop.xlane.xlu0 %471 }
 0x119   :  { %v506_v52 = vmax.f32 %v472_v30, 1.0 }
 0x11a   :  { %v475_v31 = vpop.xlane.xlu1 %474 }
 0x11b   :  { %v507_v46 = vmax.f32 %v475_v31, 1.0 }
 0x14c   :  { %v221_v38 = vpop.f32.mrb[0].mxu0 }
 0x14d   :  { %v540_v50 = vmul.f32 %v1558_v29, %v221_v38  ;;  %v223_v51 = vpop.f32.mrb[1].mxu0 }
 0x14f   :  { %681 = vmatmul.mubr.f32.vlgmr.msra.gmra.mrb[0].mxu1 %v540_v50  ;;  %v1580_v50 = vpop.eup %1579  ;;  %1611 = vrcp.f32 %v503_v26 }
 0x150   :  { %v226_v58 = vpop.f32.mrb[2].mxu0  ;;  %686 = vmatprep.mubr.f32.mxu1 %v1915_v42 }
 0x151   :  { %v541_v62 = vmul.f32 %v1560_v57, %v226_v58  ;;  %v228_v63 = vpop.f32.mrb[3].mxu0 }
 0x153   :  { %687 = vmatmul.mubr.f32.gmra.mrb[2].mxu1 %v541_v62  ;;  %v1582_v62 = vpop.eup %1581  ;;  %1613 = vrcp.f32 %v504_v11 }
 0x154   :  { %v231_v25 = vpop.f32.mrb[4].mxu0  ;;  %692 = vmatprep.mubr.f32.mxu1 %v1915_v42 }
 0x155   :  { %v542_v34 = vmul.f32 %v1562_v2, %v231_v25  ;;  %v233_v45 = vpop.f32.mrb[5].mxu0 }
 0x157   :  { %693 = vmatmul.mubr.f32.gmra.mrb[4].mxu1 %v542_v34  ;;  %v1584_v34 = vpop.eup %1583  ;;  %1615 = vrcp.f32 %v505_v14 }
 0x158   :  { %v236_v20 = vpop.f32.mrb[6].mxu0  ;;  %698 = vmatprep.mubr.f32.mxu1 %v1915_v42 }
 0x159   :  { %v543_v22 = vmul.f32 %v1564_v5, %v236_v20  ;;  %v238_v27 = vpop.f32.mrb[7].mxu0 }
 0x15b   :  { %699 = vmatmul.mubr.f32.gmra.mrb[6].mxu1 %v543_v22  ;;  %v1586_v22 = vpop.eup %1585  ;;  %1617 = vrcp.f32 %v506_v52 }
 0x15c   :  { %v241_v23 = vpop.f32.mrb[8].mxu0  ;;  %704 = vmatprep.mubr.f32.mxu1 %v1915_v42 }
 0x15d   :  { %v544_v35 = vmul.f32 %v1566_v7, %v241_v23  ;;  %v243_v36 = vpop.f32.mrb[9].mxu0 }
 0x15f   :  { %705 = vmatmul.mubr.f32.gmra.mrb[8].mxu1 %v544_v35  ;;  %v1588_v35 = vpop.eup %1587  ;;  %1619 = vrcp.f32 %v507_v46 }
 0x160   :  { %v246_v47 = vpop.f32.mrb[10].mxu0  ;;  %710 = vmatprep.mubr.f32.mxu1 %v1915_v42 }
 0x161   :  { %v545_v15 = vmul.f32 %v1568_v44, %v246_v47  ;;  %v248_v18 = vpop.f32.mrb[11].mxu0 }
 0x163   :  { %711 = vmatmul.mubr.f32.gmra.mrb[10].mxu1 %v545_v15  ;;  %v1590_v15 = vpop.eup %1589 }
 0x164   :  { %v251_v17 = vpop.f32.mrb[12].mxu0  ;;  %716 = vmatprep.mubr.f32.mxu1 %v1915_v42 }
 0x165   :  { %v546_v32 = vmul.f32 %v1570_v0, %v251_v17  ;;  %v253_v8 = vpop.f32.mrb[13].mxu0 }
 0x167   :  { %717 = vmatmul.mubr.f32.gmra.mrb[12].mxu1 %v546_v32  ;;  %v1592_v32 = vpop.eup %1591 }
 0x168   :  { %v256_v21 = vpop.f32.mrb[14].mxu0  ;;  %722 = vmatprep.mubr.f32.mxu1 %v1915_v42 }
 0x169   :  { %v547_v37 = vmul.f32 %v1572_v13, %v256_v21  ;;  %v258_v33 = vpop.f32.mrb[15].mxu0 }
 0x16b   :  { %723 = vmatmul.mubr.f32.gmra.mrb[14].mxu1 %v547_v37  ;;  %v1594_v37 = vpop.eup %1593 }
 0x16c   :  { %v261_v41 = vpop.f32.mrb[16].mxu0  ;;  %728 = vmatprep.mubr.f32.mxu1 %v1915_v42 }
 0x16d   :  { %v548_v49 = vmul.f32 %v1574_v40, %v261_v41  ;;  %v263_v54 = vpop.f32.mrb[17].mxu0 }
 0x16f   :  { %729 = vmatmul.mubr.f32.gmra.mrb[16].mxu1 %v548_v49  ;;  %v1596_v49 = vpop.eup %1595 }
 0x170   :  { %v266_v61 = vpop.f32.mrb[18].mxu0  ;;  %734 = vmatprep.mubr.f32.mxu1 %v1915_v42 }
 0x171   :  { %v549_v4 = vmul.f32 %v1576_v60, %v266_v61  ;;  %v268_v9 = vpop.f32.mrb[19].mxu0 }
 0x173   :  { %735 = vmatmul.mubr.f32.gmra.mrb[18].mxu1 %v549_v4  ;;  %v1598_v4 = vpop.eup %1597 }
 0x174   :  { %v271_v19 = vpop.f32.mrb[20].mxu0  ;;  %740 = vmatprep.mubr.f32.mxu1 %v1915_v42 }
 0x175   :  { %v550_v29 = vmul.f32 %v1578_v16, %v271_v19  ;;  %v273_v38 = vpop.f32.mrb[21].mxu0 }
 0x177   :  { %741 = vmatmul.mubr.f32.gmra.mrb[20].mxu1 %v550_v29  ;;  %v1600_v29 = vpop.eup %1599 }
 0x178   :  { %v276_v51 = vpop.f32.mrb[22].mxu0  ;;  %746 = vmatprep.mubr.f32.mxu1 %v1915_v42 }
 0x179   :  { %v551_v57 = vmul.f32 %v1580_v50, %v276_v51  ;;  %v278_v58 = vpop.f32.mrb[23].mxu0 }
 0x17b   :  { %747 = vmatmul.mubr.f32.gmra.mrb[22].mxu1 %v551_v57  ;;  %v1602_v57 = vpop.eup %1601 }
 0x17c   :  { %v281_v63 = vpop.f32.mrb[24].mxu0  ;;  %752 = vmatprep.mubr.f32.mxu1 %v1915_v42 }
 0x17d   :  { %v552_v2 = vmul.f32 %v1582_v62, %v281_v63  ;;  %v283_v25 = vpop.f32.mrb[25].mxu0 }
 0x17f   :  { %753 = vmatmul.mubr.f32.gmra.mrb[24].mxu1 %v552_v2  ;;  %v1604_v2 = vpop.eup %1603 }
 0x180   :  { %v286_v45 = vpop.f32.mrb[26].mxu0  ;;  %758 = vmatprep.mubr.f32.mxu1 %v1915_v42 }
 0x181   :  { %v553_v5 = vmul.f32 %v1584_v34, %v286_v45  ;;  %v288_v20 = vpop.f32.mrb[27].mxu0 }
 0x183   :  { %759 = vmatmul.mubr.f32.gmra.mrb[26].mxu1 %v553_v5  ;;  %v1606_v5 = vpop.eup %1605 }
 0x184   :  { %v291_v27 = vpop.f32.mrb[28].mxu0  ;;  %764 = vmatprep.mubr.f32.mxu1 %v1915_v42 }
 0x185   :  { %v554_v7 = vmul.f32 %v1586_v22, %v291_v27  ;;  %v293_v23 = vpop.f32.mrb[29].mxu0 }
 0x187   :  { %765 = vmatmul.mubr.f32.gmra.mrb[28].mxu1 %v554_v7  ;;  %v1608_v7 = vpop.eup %1607 }
 0x188   :  { %v296_v36 = vpop.f32.mrb[30].mxu0  ;;  %770 = vmatprep.mubr.f32.mxu1 %v1915_v42 }
 0x189   :  { %v555_v44 = vmul.f32 %v1588_v35, %v296_v36  ;;  %v298_v47 = vpop.f32.mrb[31].mxu0 }
 0x18b   :  { %771 = vmatmul.mubr.f32.gmra.mrb[30].mxu1 %v555_v44  ;;  %v1610_v44 = vpop.eup %1609 }
 0x18c   :  { %v301_v18 = vpop.f32.mrb[32].mxu0  ;;  %776 = vmatprep.mubr.f32.mxu1 %v1915_v42 }
 0x18d   :  { %v556_v0 = vmul.f32 %v1590_v15, %v301_v18  ;;  %v303_v17 = vpop.f32.mrb[33].mxu0 }
 0x18f   :  { %777 = vmatmul.mubr.f32.gmra.mrb[32].mxu1 %v556_v0  ;;  %v1612_v0 = vpop.eup %1611 }
 0x190   :  { %v306_v8 = vpop.f32.mrb[34].mxu0  ;;  %782 = vmatprep.mubr.f32.mxu1 %v1915_v42  ;;  %v1614_v12 = vpop.eup %1613 }
 0x191   :  { %v557_v13 = vmul.f32 %v1592_v32, %v306_v8  ;;  %v308_v21 = vpop.f32.mrb[35].mxu0 }
 0x193   :  { %783 = vmatmul.mubr.f32.gmra.mrb[34].mxu1 %v557_v13 }
 0x194   :  { %v311_v33 = vpop.f32.mrb[36].mxu0  ;;  %788 = vmatprep.mubr.f32.mxu1 %v1915_v42 }
 0x195   :  { %v558_v40 = vmul.f32 %v1594_v37, %v311_v33  ;;  %v313_v41 = vpop.f32.mrb[37].mxu0  ;;  %v1616_v37 = vpop.eup %1615 }
 0x196   :  { %v1618_v41 = vpop.eup %1617 }
 0x197   :  { %789 = vmatmul.mubr.f32.gmra.mrb[36].mxu1 %v558_v40  ;;  %v1620_v55 = vpop.eup %1619 }
 0x198   :  { %v316_v54 = vpop.f32.mrb[38].mxu0  ;;  %794 = vmatprep.mubr.f32.mxu1 %v1915_v42 }
 0x199   :  { %v559_v60 = vmul.f32 %v1596_v49, %v316_v54  ;;  %v318_v61 = vpop.f32.mrb[39].mxu0 }
 0x19b   :  { %795 = vmatmul.mubr.f32.gmra.mrb[38].mxu1 %v559_v60 }
 0x19c   :  { %v321_v9 = vpop.f32.mrb[40].mxu0  ;;  %800 = vmatprep.mubr.f32.mxu1 %v1915_v42 }
 0x19d   :  { %v560_v16 = vmul.f32 %v1598_v4, %v321_v9  ;;  %v323_v19 = vpop.f32.mrb[41].mxu0  ;;  %v606_v4 = vlaneseq }
 0x19f   :  { %801 = vmatmul.mubr.f32.gmra.mrb[40].mxu1 %v560_v16  ;;  %v607_v9 = vshrl.u32 %v606_v4, 7  ;;  %v604_v16 = vld [vmem:[%s2885_s3] sm:$0x3]  ;;  %s1916_s3 = smov [#allocation8]  }
 0x1a0   :  { %v326_v38 = vpop.f32.mrb[42].mxu0  ;;  %806 = vmatprep.mubr.f32.mxu1 %v1915_v42  ;;  %s1454_s28 = sshll.u32 %s1916_s3, 4  ;;  %s1455_s28 = int_to_ptr.vmem [resolvable:$true] %s1454_s28 }
 0x1a1   :  { %v561_v50 = vmul.f32 %v1600_v29, %v326_v38  ;;  %v328_v51 = vpop.f32.mrb[43].mxu0  ;;  %v608_v10 = vsub.s32 0, %v607_v9  ;;  %v612_v19 = vsub.s32 1, %v607_v9  ;;  %s1879_s29 = scalar_lea.vmem %s1455_s28, 8192  ;;  %p1884_p11 = scmp.lt.s32.totalorder %s1455_s28, %s1455_s28 }
 0x1a2   :  { %p1880_p10 = scmp.ne.s32.totalorder %s1455_s28, %s1879_s29  ;;  %p1885_p12 = scmp.lt.s32.totalorder %s1879_s29, %s1879_s29 }
 0x1a3   :  { %807 = vmatmul.mubr.f32.gmra.mrb[42].mxu1 %v561_v50  ;;  %v2287_v28 = vrot.slane %v604_v16, %v608_v10  ;;  %v2289_v29 = vrot.slane %v604_v16, %v612_v19 }
 0x1a4   :  { %v331_v58 = vpop.f32.mrb[44].mxu0  ;;  %812 = vmatprep.mubr.f32.mxu1 %v1915_v42  ;;  %p1886_p13 = por %p1885_p12, %p1884_p11 }
 0x1a5   :  { %v562_v62 = vmul.f32 %v1602_v57, %v331_v58  ;;  %v333_v63 = vpop.f32.mrb[45].mxu0 }
 0x1a6   :  { %p1887_p0 = pnand %p1886_p13, %p1880_p10 }
 0x1a7   :  { %813 = vmatmul.mubr.f32.gmra.mrb[44].mxu1 %v562_v62 }
 0x1a8   :  { %v336_v25 = vpop.f32.mrb[46].mxu0  ;;  %818 = vmatprep.mubr.f32.mxu1 %v1915_v42 }
 0x1a9   :  { %v563_v34 = vmul.f32 %v1604_v2, %v336_v25  ;;  %v338_v45 = vpop.f32.mrb[47].mxu0 }
 0x1ab   :  { %819 = vmatmul.mubr.f32.gmra.mrb[46].mxu1 %v563_v34 }
 0x1ac   :  { %v341_v20 = vpop.f32.mrb[48].mxu0  ;;  %824 = vmatprep.mubr.f32.mxu1 %v1915_v42 }
 0x1ad   :  { %v564_v22 = vmul.f32 %v1606_v5, %v341_v20  ;;  %v343_v27 = vpop.f32.mrb[49].mxu0 }
 0x1af   :  { %825 = vmatmul.mubr.f32.gmra.mrb[48].mxu1 %v564_v22 }
 0x1b0   :  { %v346_v23 = vpop.f32.mrb[50].mxu0  ;;  %830 = vmatprep.mubr.f32.mxu1 %v1915_v42 }
 0x1b1   :  { %v565_v35 = vmul.f32 %v1608_v7, %v346_v23  ;;  %v348_v36 = vpop.f32.mrb[51].mxu0 }
 0x1b3   :  { %831 = vmatmul.mubr.f32.gmra.mrb[50].mxu1 %v565_v35 }
 0x1b4   :  { %v351_v47 = vpop.f32.mrb[52].mxu0  ;;  %836 = vmatprep.mubr.f32.mxu1 %v1915_v42 }
 0x1b5   :  { %v566_v15 = vmul.f32 %v1610_v44, %v351_v47  ;;  %v353_v18 = vpop.f32.mrb[53].mxu0 }
 0x1b7   :  { %837 = vmatmul.mubr.f32.gmra.mrb[52].mxu1 %v566_v15 }
 0x1b8   :  { %v356_v17 = vpop.f32.mrb[54].mxu0  ;;  %842 = vmatprep.mubr.f32.mxu1 %v1915_v42 }
 0x1b9   :  { %v567_v32 = vmul.f32 %v1612_v0, %v356_v17  ;;  %v358_v8 = vpop.f32.mrb[55].mxu0 }
 0x1bb   :  { %843 = vmatmul.mubr.f32.gmra.mrb[54].mxu1 %v567_v32 }
 0x1bc   :  { %v361_v13 = vpop.f32.mrb[56].mxu0  ;;  %848 = vmatprep.mubr.f32.mxu1 %v1915_v42 }
 0x1bd   :  { %v568_v21 = vmul.f32 %v1614_v12, %v361_v13  ;;  %v363_v24 = vpop.f32.mrb[57].mxu0 }
 0x1bf   :  { %849 = vmatmul.mubr.f32.gmra.mrb[56].mxu1 %v568_v21 }
 0x1c0   :  { %v366_v33 = vpop.f32.mrb[58].mxu0  ;;  %854 = vmatprep.mubr.f32.mxu1 %v1915_v42 }
 0x1c1   :  { %v569_v39 = vmul.f32 %v1616_v37, %v366_v33  ;;  %v368_v40 = vpop.f32.mrb[59].mxu0 }
 0x1c3   :  { %855 = vmatmul.mubr.f32.gmra.mrb[58].mxu1 %v569_v39 }
 0x1c4   :  { %v371_v48 = vpop.f32.mrb[60].mxu0  ;;  %860 = vmatprep.mubr.f32.mxu1 %v1915_v42 }
 0x1c5   :  { %v570_v49 = vmul.f32 %v1618_v41, %v371_v48  ;;  %v373_v54 = vpop.f32.mrb[61].mxu0 }
 0x1c7   :  { %861 = vmatmul.mubr.f32.gmra.mrb[60].mxu1 %v570_v49 }
 0x1c8   :  { %v376_v60 = vpop.f32.mrb[62].mxu0  ;;  %866 = vmatprep.mubr.f32.mxu1 %v1915_v42 }
 0x1c9   :  { %v571_v61 = vmul.f32 %v1620_v55, %v376_v60  ;;  %v378_v3 = vpop.f32.mrb[63].mxu0 }
 0x1cb   :  { %867 = vmatmul.mubr.f32.gmra.mrb[62].mxu1 %v571_v61 }
 0x222   :  { %v682_v38 = vpop.f32.mrb[0].mxu1 }
 0x223   :  { %v2292_v43 = vadd.f32 %v682_v38, %v2287_v28  ;;  %v684_v42 = vpop.f32.mrb[1].mxu1 }
 0x224   :  { %v2295_v50 = vadd.f32 %v684_v42, %v2289_v29 }
 0x226   :  { %v688_v51 = vpop.f32.mrb[2].mxu1  ;;  %v873_v56 = vmax.f32 %v2292_v43, %v2295_v50 }
 0x227   :  { %v2300_v57 = vadd.f32 %v688_v51, %v2287_v28  ;;  %v690_v58 = vpop.f32.mrb[3].mxu1 }
 0x228   :  { %v2303_v59 = vadd.f32 %v690_v58, %v2289_v29  ;;  %874 = vmax.xlane.f32.xlu0 %v873_v56 }
 0x22a   :  { %v694_v62 = vpop.f32.mrb[4].mxu1  ;;  %v876_v63 = vmax.f32 %v2300_v57, %v2303_v59 }
 0x22b   :  { %v2308_v1 = vadd.f32 %v694_v62, %v2287_v28  ;;  %v696_v2 = vpop.f32.mrb[5].mxu1 }
 0x22c   :  { %v2311_v25 = vadd.f32 %v696_v2, %v2289_v29  ;;  %877 = vmax.xlane.f32.xlu1 %v876_v63 }
 0x22e   :  { %v700_v26 = vpop.f32.mrb[6].mxu1  ;;  %v879_v34 = vmax.f32 %v2308_v1, %v2311_v25 }
 0x22f   :  { %v2316_v45 = vadd.f32 %v700_v26, %v2287_v28  ;;  %v702_v53 = vpop.f32.mrb[7].mxu1 }
 0x230   :  { %v2319_v5 = vadd.f32 %v702_v53, %v2289_v29  ;;  %880 = vmax.xlane.f32.xlu0 %v879_v34 }
 0x232   :  { %v706_v20 = vpop.f32.mrb[8].mxu1  ;;  %v882_v11 = vmax.f32 %v2316_v45, %v2319_v5 }
 0x233   :  { %v2324_v22 = vadd.f32 %v706_v20, %v2287_v28  ;;  %v708_v27 = vpop.f32.mrb[9].mxu1 }
 0x234   :  { %v2327_v6 = vadd.f32 %v708_v27, %v2289_v29  ;;  %883 = vmax.xlane.f32.xlu1 %v882_v11 }
 0x236   :  { %v712_v7 = vpop.f32.mrb[10].mxu1  ;;  %v885_v23 = vmax.f32 %v2324_v22, %v2327_v6 }
 0x237   :  { %v2332_v14 = vadd.f32 %v712_v7, %v2287_v28  ;;  %v714_v35 = vpop.f32.mrb[11].mxu1 }
 0x238   :  { %v2335_v36 = vadd.f32 %v714_v35, %v2289_v29  ;;  %886 = vmax.xlane.f32.xlu0 %v885_v23 }
 0x23a   :  { %v718_v30 = vpop.f32.mrb[12].mxu1  ;;  %v888_v44 = vmax.f32 %v2332_v14, %v2335_v36 }
 0x23b   :  { %v2340_v47 = vadd.f32 %v718_v30, %v2287_v28  ;;  %v720_v52 = vpop.f32.mrb[13].mxu1 }
 0x23c   :  { %v2343_v15 = vadd.f32 %v720_v52, %v2289_v29  ;;  %889 = vmax.xlane.f32.xlu1 %v888_v44 }
 0x23e   :  { %v724_v18 = vpop.f32.mrb[14].mxu1  ;;  %v891_v31 = vmax.f32 %v2340_v47, %v2343_v15 }
 0x23f   :  { %v2348_v0 = vadd.f32 %v724_v18, %v2287_v28  ;;  %v726_v17 = vpop.f32.mrb[15].mxu1 }
 0x240   :  { %v2351_v46 = vadd.f32 %v726_v17, %v2289_v29  ;;  %892 = vmax.xlane.f32.xlu0 %v891_v31 }
 0x242   :  { %v730_v32 = vpop.f32.mrb[16].mxu1  ;;  %v894_v8 = vmax.f32 %v2348_v0, %v2351_v46 }
 0x243   :  { %v2356_v12 = vadd.f32 %v730_v32, %v2287_v28  ;;  %v732_v13 = vpop.f32.mrb[17].mxu1 }
 0x244   :  { %v2359_v21 = vadd.f32 %v732_v13, %v2289_v29  ;;  %895 = vmax.xlane.f32.xlu1 %v894_v8 }
 0x246   :  { %v736_v24 = vpop.f32.mrb[18].mxu1  ;;  %v897_v37 = vmax.f32 %v2356_v12, %v2359_v21 }
 0x247   :  { %v2364_v33 = vadd.f32 %v736_v24, %v2287_v28  ;;  %v738_v39 = vpop.f32.mrb[19].mxu1 }
 0x248   :  { %v2367_v40 = vadd.f32 %v738_v39, %v2289_v29  ;;  %898 = vmax.xlane.f32.xlu0 %v897_v37 }
 0x24a   :  { %v742_v41 = vpop.f32.mrb[20].mxu1  ;;  %v900_v48 = vmax.f32 %v2364_v33, %v2367_v40 }
 0x24b   :  { %v2372_v49 = vadd.f32 %v742_v41, %v2287_v28  ;;  %v744_v54 = vpop.f32.mrb[21].mxu1 }
 0x24c   :  { %v2375_v55 = vadd.f32 %v744_v54, %v2289_v29  ;;  %901 = vmax.xlane.f32.xlu1 %v900_v48 }
 0x24e   :  { %v748_v60 = vpop.f32.mrb[22].mxu1  ;;  %v903_v61 = vmax.f32 %v2372_v49, %v2375_v55 }
 0x24f   :  { %v2380_v3 = vadd.f32 %v748_v60, %v2287_v28  ;;  %v750_v4 = vpop.f32.mrb[23].mxu1 }
 0x250   :  { %v2383_v9 = vadd.f32 %v750_v4, %v2289_v29  ;;  %904 = vmax.xlane.f32.xlu0 %v903_v61 }
 0x252   :  { %v754_v10 = vpop.f32.mrb[24].mxu1  ;;  %v906_v16 = vmax.f32 %v2380_v3, %v2383_v9 }
 0x253   :  { %v2388_v19 = vadd.f32 %v754_v10, %v2287_v28  ;;  %v756_v38 = vpop.f32.mrb[25].mxu1 }
 0x254   :  { %v2391_v42 = vadd.f32 %v756_v38, %v2289_v29  ;;  %907 = vmax.xlane.f32.xlu1 %v906_v16 }
 0x256   :  { %v760_v51 = vpop.f32.mrb[26].mxu1  ;;  %v909_v56 = vmax.f32 %v2388_v19, %v2391_v42 }
 0x257   :  { %v2396_v58 = vadd.f32 %v760_v51, %v2287_v28  ;;  %v762_v62 = vpop.f32.mrb[27].mxu1 }
 0x258   :  { %v2399_v63 = vadd.f32 %v762_v62, %v2289_v29  ;;  %910 = vmax.xlane.f32.xlu0 %v909_v56 }
 0x25a   :  { %v766_v2 = vpop.f32.mrb[28].mxu1  ;;  %v912_v26 = vmax.f32 %v2396_v58, %v2399_v63 }
 0x25b   :  { %v2404_v34 = vadd.f32 %v766_v2, %v2287_v28  ;;  %v768_v53 = vpop.f32.mrb[29].mxu1 }
 0x25c   :  { %v2407_v20 = vadd.f32 %v768_v53, %v2289_v29  ;;  %913 = vmax.xlane.f32.xlu1 %v912_v26 }
 0x25e   :  { %v772_v11 = vpop.f32.mrb[30].mxu1  ;;  %v915_v27 = vmax.f32 %v2404_v34, %v2407_v20 }
 0x25f   :  { %v2412_v7 = vadd.f32 %v772_v11, %v2287_v28  ;;  %v774_v23 = vpop.f32.mrb[31].mxu1 }
 0x260   :  { %v2415_v35 = vadd.f32 %v774_v23, %v2289_v29  ;;  %916 = vmax.xlane.f32.xlu0 %v915_v27 }
 0x262   :  { %v778_v30 = vpop.f32.mrb[32].mxu1  ;;  %v918_v44 = vmax.f32 %v2412_v7, %v2415_v35 }
 0x263   :  { %v2420_v52 = vadd.f32 %v778_v30, %v2287_v28  ;;  %v780_v18 = vpop.f32.mrb[33].mxu1 }
 0x264   :  { %v2423_v31 = vadd.f32 %v780_v18, %v2289_v29  ;;  %919 = vmax.xlane.f32.xlu1 %v918_v44 }
 0x266   :  { %v784_v17 = vpop.f32.mrb[34].mxu1  ;;  %v921_v32 = vmax.f32 %v2420_v52, %v2423_v31 }
 0x267   :  { %v2428_v8 = vadd.f32 %v784_v17, %v2287_v28  ;;  %v786_v13 = vpop.f32.mrb[35].mxu1 }
 0x268   :  { %v2431_v24 = vadd.f32 %v786_v13, %v2289_v29  ;;  %922 = vmax.xlane.f32.xlu0 %v921_v32 }
 0x26a   :  { %v790_v37 = vpop.f32.mrb[36].mxu1  ;;  %v924_v39 = vmax.f32 %v2428_v8, %v2431_v24 }
 0x26b   :  { %v2436_v41 = vadd.f32 %v790_v37, %v2287_v28  ;;  %v792_v48 = vpop.f32.mrb[37].mxu1 }
 0x26c   :  { %v2439_v54 = vadd.f32 %v792_v48, %v2289_v29  ;;  %925 = vmax.xlane.f32.xlu1 %v924_v39 }
 0x26e   :  { %v796_v60 = vpop.f32.mrb[38].mxu1  ;;  %v927_v61 = vmax.f32 %v2436_v41, %v2439_v54 }
 0x26f   :  { %v2444_v4 = vadd.f32 %v796_v60, %v2287_v28  ;;  %v798_v10 = vpop.f32.mrb[39].mxu1 }
 0x270   :  { %v2447_v16 = vadd.f32 %v798_v10, %v2289_v29  ;;  %928 = vmax.xlane.f32.xlu0 %v927_v61 }
 0x272   :  { %v802_v38 = vpop.f32.mrb[40].mxu1  ;;  %v930_v51 = vmax.f32 %v2444_v4, %v2447_v16 }
 0x273   :  { %v2452_v56 = vadd.f32 %v802_v38, %v2287_v28  ;;  %v804_v62 = vpop.f32.mrb[41].mxu1 }
 0x274   :  { %v2455_v2 = vadd.f32 %v804_v62, %v2289_v29  ;;  %931 = vmax.xlane.f32.xlu1 %v930_v51 }
 0x276   :  { %v808_v26 = vpop.f32.mrb[42].mxu1  ;;  %v933_v53 = vmax.f32 %v2452_v56, %v2455_v2 }
 0x277   :  { %v2460_v11 = vadd.f32 %v808_v26, %v2287_v28  ;;  %v810_v27 = vpop.f32.mrb[43].mxu1 }
 0x278   :  { %v2463_v23 = vadd.f32 %v810_v27, %v2289_v29  ;;  %934 = vmax.xlane.f32.xlu0 %v933_v53 }
 0x27a   :  { %v814_v30 = vpop.f32.mrb[44].mxu1  ;;  %v936_v44 = vmax.f32 %v2460_v11, %v2463_v23 }
 0x27b   :  { %v2468_v18 = vadd.f32 %v814_v30, %v2287_v28  ;;  %v816_v17 = vpop.f32.mrb[45].mxu1 }
 0x27c   :  { %v2471_v32 = vadd.f32 %v816_v17, %v2289_v29  ;;  %937 = vmax.xlane.f32.xlu1 %v936_v44 }
 0x27e   :  { %v820_v13 = vpop.f32.mrb[46].mxu1  ;;  %v939_v37 = vmax.f32 %v2468_v18, %v2471_v32 }
 0x27f   :  { %v2476_v39 = vadd.f32 %v820_v13, %v2287_v28  ;;  %v822_v48 = vpop.f32.mrb[47].mxu1 }
 0x280   :  { %v2479_v60 = vadd.f32 %v822_v48, %v2289_v29  ;;  %940 = vmax.xlane.f32.xlu0 %v939_v37 }
 0x282   :  { %v826_v61 = vpop.f32.mrb[48].mxu1  ;;  %v942_v10 = vmax.f32 %v2476_v39, %v2479_v60 }
 0x283   :  { %v2484_v38 = vadd.f32 %v826_v61, %v2287_v28  ;;  %v828_v51 = vpop.f32.mrb[49].mxu1 }
 0x284   :  { %v2487_v62 = vadd.f32 %v828_v51, %v2289_v29  ;;  %943 = vmax.xlane.f32.xlu1 %v942_v10 }
 0x286   :  { %v832_v26 = vpop.f32.mrb[50].mxu1  ;;  %v945_v53 = vmax.f32 %v2484_v38, %v2487_v62 }
 0x287   :  { %v2492_v27 = vadd.f32 %v832_v26, %v2287_v28  ;;  %v834_v30 = vpop.f32.mrb[51].mxu1 }
 0x288   :  { %v2495_v44 = vadd.f32 %v834_v30, %v2289_v29  ;;  %946 = vmax.xlane.f32.xlu0 %v945_v53 }
 0x289   :  { %2925 = vst [vmem:[#allocation12_spill] sm:$0xff] %v2492_v27 }
 0x28a   :  { %2926 = vst [vmem:[#allocation13_spill] sm:$0xff] %v2495_v44  ;;  %v838_v17 = vpop.f32.mrb[52].mxu1  ;;  %v948_v13 = vmax.f32 %v2492_v27, %v2495_v44 }
 0x28b   :  { %v2500_v37 = vadd.f32 %v838_v17, %v2287_v28  ;;  %v840_v48 = vpop.f32.mrb[53].mxu1 }
 0x28c   :  { %v2503_v61 = vadd.f32 %v840_v48, %v2289_v29  ;;  %949 = vmax.xlane.f32.xlu1 %v948_v13 }
 0x28d   :  { %2927 = vst [vmem:[#allocation14_spill] sm:$0xff] %v2500_v37 }
 0x28e   :  { %2928 = vst [vmem:[#allocation15_spill] sm:$0xff] %v2503_v61  ;;  %v844_v10 = vpop.f32.mrb[54].mxu1  ;;  %v951_v51 = vmax.f32 %v2500_v37, %v2503_v61 }
 0x28f   :  { %v2508_v26 = vadd.f32 %v844_v10, %v2287_v28  ;;  %v846_v53 = vpop.f32.mrb[55].mxu1 }
 0x290   :  { %v2511_v30 = vadd.f32 %v846_v53, %v2289_v29  ;;  %952 = vmax.xlane.f32.xlu0 %v951_v51 }
 0x291   :  { %2929 = vst [vmem:[#allocation16_spill] sm:$0xff] %v2508_v26 }
 0x292   :  { %2930 = vst [vmem:[#allocation17_spill] sm:$0xff] %v2511_v30  ;;  %v850_v44 = vpop.f32.mrb[56].mxu1  ;;  %v954_v17 = vmax.f32 %v2508_v26, %v2511_v30 }
 0x293   :  { %v2516_v48 = vadd.f32 %v850_v44, %v2287_v28  ;;  %v852_v13 = vpop.f32.mrb[57].mxu1 }
 0x294   :  { %v2519_v27 = vadd.f32 %v852_v13, %v2289_v29  ;;  %955 = vmax.xlane.f32.xlu1 %v954_v17 }
 0x295   :  { %2931 = vst [vmem:[#allocation18_spill] sm:$0xff] %v2516_v48 }
 0x296   :  { %2932 = vst [vmem:[#allocation19_spill] sm:$0xff] %v2519_v27  ;;  %v856_v61 = vpop.f32.mrb[58].mxu1  ;;  %v957_v10 = vmax.f32 %v2516_v48, %v2519_v27 }
 0x297   :  { %v2524_v53 = vadd.f32 %v856_v61, %v2287_v28  ;;  %v858_v51 = vpop.f32.mrb[59].mxu1 }
 0x298   :  { %v2527_v37 = vadd.f32 %v858_v51, %v2289_v29  ;;  %958 = vmax.xlane.f32.xlu0 %v957_v10 }
 0x29a   :  { %2933 = vst [vmem:[#allocation20_spill] sm:$0xff] %v2527_v37  ;;  %v862_v30 = vpop.f32.mrb[60].mxu1  ;;  %v960_v44 = vmax.f32 %v2524_v53, %v2527_v37 }
 0x29b   :  { %v2532_v13 = vadd.f32 %v862_v30, %v2287_v28  ;;  %v864_v17 = vpop.f32.mrb[61].mxu1 }
 0x29c   :  { %v2535_v26 = vadd.f32 %v864_v17, %v2289_v29  ;;  %961 = vmax.xlane.f32.xlu1 %v960_v44 }
 0x29e   :  { %2934 = vst [vmem:[#allocation21_spill] sm:$0xff] %v2535_v26  ;;  %v868_v27 = vpop.f32.mrb[62].mxu1  ;;  %v963_v61 = vmax.f32 %v2532_v13, %v2535_v26 }
 0x29f   :  { %v2540_v51 = vadd.f32 %v868_v27, %v2287_v28  ;;  %v870_v10 = vpop.f32.mrb[63].mxu1 }
 0x2a0   :  { %v2543_v48 = vadd.f32 %v870_v10, %v2289_v29  ;;  %964 = vmax.xlane.f32.xlu0 %v963_v61 }
 0x2a2   :  { %v966_v30 = vmax.f32 %v2540_v51, %v2543_v48 }
 0x2a4   :  { %967 = vmax.xlane.f32.xlu1 %v966_v30 }
 0x2b5   :  { %v875_v37 = vpop.xlane.xlu0 %874 }
 0x2b6   :  { %v2548_v17 = vsub.f32 %v2292_v43, %v875_v37  ;;  %v2551_v44 = vsub.f32 %v2295_v50, %v875_v37 }
 0x2b8   :  { %v1033_v26 = vmul.f32 1.442695, %v2548_v17  ;;  %v1035_v28 = vmul.f32 1.442695, %v2551_v44 }
 0x2b9   :  { %v878_v27 = vpop.xlane.xlu1 %877 }
 0x2ba   :  { %1621 = vpow2.f32 %v1033_v26  ;;  %v2556_v29 = vsub.f32 %v2300_v57, %v878_v27  ;;  %v2559_v61 = vsub.f32 %v2303_v59, %v878_v27 }
 0x2bb   :  { %1623 = vpow2.f32 %v1035_v28 }
 0x2bc   :  { %v1037_v10 = vmul.f32 1.442695, %v2556_v29  ;;  %v1039_v43 = vmul.f32 1.442695, %v2559_v61 }
 0x2bd   :  { %v881_v30 = vpop.xlane.xlu0 %880 }
 0x2be   :  { %1625 = vpow2.f32 %v1037_v10  ;;  %v2564_v50 = vsub.f32 %v2308_v1, %v881_v30  ;;  %v2567_v37 = vsub.f32 %v2311_v25, %v881_v30 }
 0x2bf   :  { %1627 = vpow2.f32 %v1039_v43 }
 0x2c0   :  { %2935 = vst [vmem:[#allocation22_spill] sm:$0xff] %v2564_v50  ;;  %2936 = vst [vmem:[#allocation23_spill] sm:$0xff] %v2567_v37  ;;  %v1041_v57 = vmul.f32 1.442695, %v2564_v50  ;;  %v1043_v26 = vmul.f32 1.442695, %v2567_v37 }
 0x2c1   :  { %v884_v59 = vpop.xlane.xlu1 %883 }
 0x2c2   :  { %1629 = vpow2.f32 %v1041_v57  ;;  %v2572_v28 = vsub.f32 %v2316_v45, %v884_v59  ;;  %v2575_v27 = vsub.f32 %v2319_v5, %v884_v59 }
 0x2c3   :  { %1631 = vpow2.f32 %v1043_v26 }
 0x2c4   :  { %2937 = vst [vmem:[#allocation24_spill] sm:$0xff] %v2572_v28  ;;  %2938 = vst [vmem:[#allocation25_spill] sm:$0xff] %v2575_v27  ;;  %v1622_v10 = vpop.eup %1621  ;;  %v1045_v1 = vmul.f32 1.442695, %v2572_v28  ;;  %v1047_v25 = vmul.f32 1.442695, %v2575_v27 }
 0x2c5   :  { %v1624_v30 = vpop.eup %1623  ;;  %v887_v43 = vpop.xlane.xlu0 %886 }
 0x2c6   :  { %1633 = vpow2.f32 %v1045_v1  ;;  %v2580_v50 = vsub.f32 %v2324_v22, %v887_v43  ;;  %v2583_v57 = vsub.f32 %v2327_v6, %v887_v43  ;;  %v1161_v45 = vadd.f32 %v1624_v30, %v1622_v10 }
 0x2c7   :  { %1635 = vpow2.f32 %v1047_v25 }
 0x2c8   :  { %v1626_v37 = vpop.eup %1625  ;;  %v1049_v5 = vmul.f32 1.442695, %v2580_v50  ;;  %v1051_v26 = vmul.f32 1.442695, %v2583_v57  ;;  %1162 = vadd.xlane.f32.xlu0 %v1161_v45 }
 0x2c9   :  { %v1628_v59 = vpop.eup %1627  ;;  %v890_v28 = vpop.xlane.xlu1 %889 }
 0x2ca   :  { %1637 = vpow2.f32 %v1049_v5  ;;  %v2588_v27 = vsub.f32 %v2332_v14, %v890_v28  ;;  %v2591_v22 = vsub.f32 %v2335_v36, %v890_v28  ;;  %v1164_v1 = vadd.f32 %v1628_v59, %v1626_v37 }
 0x2cb   :  { %1639 = vpow2.f32 %v1051_v26 }
 0x2cc   :  { %v1630_v6 = vpop.eup %1629  ;;  %v1053_v10 = vmul.f32 1.442695, %v2588_v27  ;;  %v1055_v25 = vmul.f32 1.442695, %v2591_v22  ;;  %1165 = vadd.xlane.f32.xlu1 %v1164_v1 }
 0x2cd   :  { %v1632_v30 = vpop.eup %1631  ;;  %v893_v43 = vpop.xlane.xlu0 %892 }
 0x2ce   :  { %1641 = vpow2.f32 %v1053_v10  ;;  %v2596_v45 = vsub.f32 %v2340_v47, %v893_v43  ;;  %v2599_v14 = vsub.f32 %v2343_v15, %v893_v43  ;;  %v1167_v5 = vadd.f32 %v1632_v30, %v1630_v6 }
 0x2cf   :  { %1643 = vpow2.f32 %v1055_v25 }
 0x2d0   :  { %v1634_v36 = vpop.eup %1633  ;;  %v1057_v37 = vmul.f32 1.442695, %v2596_v45  ;;  %v1059_v28 = vmul.f32 1.442695, %v2599_v14  ;;  %1168 = vadd.xlane.f32.xlu0 %v1167_v5 }
 0x2d1   :  { %v1636_v26 = vpop.eup %1635  ;;  %v896_v59 = vpop.xlane.xlu1 %895 }
 0x2d2   :  { %1645 = vpow2.f32 %v1057_v37  ;;  %v2604_v1 = vsub.f32 %v2348_v0, %v896_v59  ;;  %v2607_v47 = vsub.f32 %v2351_v46, %v896_v59  ;;  %v1170_v10 = vadd.f32 %v1636_v26, %v1634_v36 }
 0x2d3   :  { %1647 = vpow2.f32 %v1059_v28 }
 0x2d4   :  { %v1638_v15 = vpop.eup %1637  ;;  %v1061_v6 = vmul.f32 1.442695, %v2604_v1  ;;  %v1063_v25 = vmul.f32 1.442695, %v2607_v47  ;;  %1171 = vadd.xlane.f32.xlu1 %v1170_v10 }
 0x2d5   :  { %v1640_v30 = vpop.eup %1639  ;;  %v899_v43 = vpop.xlane.xlu0 %898 }
 0x2d6   :  { %1649 = vpow2.f32 %v1061_v6  ;;  %v2612_v5 = vsub.f32 %v2356_v12, %v899_v43  ;;  %v2615_v0 = vsub.f32 %v2359_v21, %v899_v43  ;;  %v1173_v37 = vadd.f32 %v1640_v30, %v1638_v15 }
 0x2d7   :  { %1651 = vpow2.f32 %v1063_v25 }
 0x2d8   :  { %v1642_v46 = vpop.eup %1641  ;;  %v1065_v36 = vmul.f32 1.442695, %v2612_v5  ;;  %v1067_v28 = vmul.f32 1.442695, %v2615_v0  ;;  %1174 = vadd.xlane.f32.xlu0 %v1173_v37 }
 0x2d9   :  { %v1644_v26 = vpop.eup %1643  ;;  %v902_v59 = vpop.xlane.xlu1 %901 }
 0x2da   :  { %1653 = vpow2.f32 %v1065_v36  ;;  %v2620_v10 = vsub.f32 %v2364_v33, %v902_v59  ;;  %v2623_v12 = vsub.f32 %v2367_v40, %v902_v59  ;;  %v1176_v6 = vadd.f32 %v1644_v26, %v1642_v46 }
 0x2db   :  { %1655 = vpow2.f32 %v1067_v28 }
 0x2dc   :  { %v1646_v21 = vpop.eup %1645  ;;  %v1069_v15 = vmul.f32 1.442695, %v2620_v10  ;;  %v1071_v25 = vmul.f32 1.442695, %v2623_v12  ;;  %1177 = vadd.xlane.f32.xlu1 %v1176_v6 }
 0x2dd   :  { %v1648_v30 = vpop.eup %1647  ;;  %v905_v43 = vpop.xlane.xlu0 %904 }
 0x2de   :  { %1657 = vpow2.f32 %v1069_v15  ;;  %v2628_v37 = vsub.f32 %v2372_v49, %v905_v43  ;;  %v2631_v33 = vsub.f32 %v2375_v55, %v905_v43  ;;  %v1179_v36 = vadd.f32 %v1648_v30, %v1646_v21 }
 0x2df   :  { %1659 = vpow2.f32 %v1071_v25 }
 0x2e0   :  { %v1650_v40 = vpop.eup %1649  ;;  %v1073_v46 = vmul.f32 1.442695, %v2628_v37  ;;  %v1075_v28 = vmul.f32 1.442695, %v2631_v33  ;;  %1180 = vadd.xlane.f32.xlu0 %v1179_v36 }
 0x2e1   :  { %v1652_v26 = vpop.eup %1651  ;;  %v908_v59 = vpop.xlane.xlu1 %907 }
 0x2e2   :  { %1661 = vpow2.f32 %v1073_v46  ;;  %v2636_v6 = vsub.f32 %v2380_v3, %v908_v59  ;;  %v2639_v49 = vsub.f32 %v2383_v9, %v908_v59  ;;  %v1182_v15 = vadd.f32 %v1652_v26, %v1650_v40 }
 0x2e3   :  { %1663 = vpow2.f32 %v1075_v28 }
 0x2e4   :  { %v1654_v55 = vpop.eup %1653  ;;  %v1077_v21 = vmul.f32 1.442695, %v2636_v6  ;;  %v1079_v25 = vmul.f32 1.442695, %v2639_v49  ;;  %1183 = vadd.xlane.f32.xlu1 %v1182_v15 }
 0x2e5   :  { %v1656_v30 = vpop.eup %1655  ;;  %v911_v43 = vpop.xlane.xlu0 %910 }
 0x2e6   :  { %1665 = vpow2.f32 %v1077_v21  ;;  %v2644_v36 = vsub.f32 %v2388_v19, %v911_v43  ;;  %v2647_v3 = vsub.f32 %v2391_v42, %v911_v43  ;;  %v1185_v46 = vadd.f32 %v1656_v30, %v1654_v55 }
 0x2e7   :  { %1667 = vpow2.f32 %v1079_v25 }
 0x2e8   :  { %v1658_v9 = vpop.eup %1657  ;;  %v1081_v40 = vmul.f32 1.442695, %v2644_v36  ;;  %v1083_v28 = vmul.f32 1.442695, %v2647_v3  ;;  %1186 = vadd.xlane.f32.xlu0 %v1185_v46 }
 0x2e9   :  { %v1660_v26 = vpop.eup %1659  ;;  %v914_v59 = vpop.xlane.xlu1 %913 }
 0x2ea   :  { %1669 = vpow2.f32 %v1081_v40  ;;  %v2652_v15 = vsub.f32 %v2396_v58, %v914_v59  ;;  %v2655_v19 = vsub.f32 %v2399_v63, %v914_v59  ;;  %v1188_v21 = vadd.f32 %v1660_v26, %v1658_v9 }
 0x2eb   :  { %1671 = vpow2.f32 %v1083_v28 }
 0x2ec   :  { %v1662_v42 = vpop.eup %1661  ;;  %v1085_v55 = vmul.f32 1.442695, %v2652_v15  ;;  %v1087_v25 = vmul.f32 1.442695, %v2655_v19  ;;  %1189 = vadd.xlane.f32.xlu1 %v1188_v21 }
 0x2ed   :  { %v1664_v30 = vpop.eup %1663  ;;  %v917_v43 = vpop.xlane.xlu0 %916 }
 0x2ee   :  { %1673 = vpow2.f32 %v1085_v55  ;;  %v2660_v46 = vsub.f32 %v2404_v34, %v917_v43  ;;  %v2663_v58 = vsub.f32 %v2407_v20, %v917_v43  ;;  %v1191_v40 = vadd.f32 %v1664_v30, %v1662_v42 }
 0x2ef   :  { %1675 = vpow2.f32 %v1087_v25 }
 0x2f0   :  { %v1666_v63 = vpop.eup %1665  ;;  %v1089_v9 = vmul.f32 1.442695, %v2660_v46  ;;  %v1091_v28 = vmul.f32 1.442695, %v2663_v58  ;;  %1192 = vadd.xlane.f32.xlu0 %v1191_v40 }
 0x2f1   :  { %v1668_v26 = vpop.eup %1667  ;;  %v920_v59 = vpop.xlane.xlu1 %919 }
 0x2f2   :  { %1677 = vpow2.f32 %v1089_v9  ;;  %v2668_v21 = vsub.f32 %v2412_v7, %v920_v59  ;;  %v2671_v34 = vsub.f32 %v2415_v35, %v920_v59  ;;  %v1194_v55 = vadd.f32 %v1668_v26, %v1666_v63 }
 0x2f3   :  { %1679 = vpow2.f32 %v1091_v28 }
 0x2f4   :  { %v1670_v20 = vpop.eup %1669  ;;  %v1093_v42 = vmul.f32 1.442695, %v2668_v21  ;;  %v1095_v25 = vmul.f32 1.442695, %v2671_v34  ;;  %1195 = vadd.xlane.f32.xlu1 %v1194_v55 }
 0x2f5   :  { %v1672_v30 = vpop.eup %1671  ;;  %v923_v43 = vpop.xlane.xlu0 %922 }
 0x2f6   :  { %1681 = vpow2.f32 %v1093_v42  ;;  %v2676_v40 = vsub.f32 %v2420_v52, %v923_v43  ;;  %v2679_v7 = vsub.f32 %v2423_v31, %v923_v43  ;;  %v1197_v9 = vadd.f32 %v1672_v30, %v1670_v20 }
 0x2f7   :  { %1683 = vpow2.f32 %v1095_v25 }
 0x2f8   :  { %v1674_v35 = vpop.eup %1673  ;;  %v1097_v63 = vmul.f32 1.442695, %v2676_v40  ;;  %v1099_v28 = vmul.f32 1.442695, %v2679_v7  ;;  %1198 = vadd.xlane.f32.xlu0 %v1197_v9 }
 0x2f9   :  { %v1676_v26 = vpop.eup %1675  ;;  %v926_v59 = vpop.xlane.xlu1 %925 }
 0x2fa   :  { %1685 = vpow2.f32 %v1097_v63  ;;  %v2684_v55 = vsub.f32 %v2428_v8, %v926_v59  ;;  %v2687_v52 = vsub.f32 %v2431_v24, %v926_v59  ;;  %v1200_v42 = vadd.f32 %v1676_v26, %v1674_v35 }
 0x2fb   :  { %1687 = vpow2.f32 %v1099_v28 }
 0x2fc   :  { %v1678_v31 = vpop.eup %1677  ;;  %v1101_v20 = vmul.f32 1.442695, %v2684_v55  ;;  %v1103_v25 = vmul.f32 1.442695, %v2687_v52  ;;  %1201 = vadd.xlane.f32.xlu1 %v1200_v42 }
 0x2fd   :  { %v1680_v30 = vpop.eup %1679  ;;  %v929_v43 = vpop.xlane.xlu0 %928 }
 0x2fe   :  { %1689 = vpow2.f32 %v1101_v20  ;;  %v2692_v9 = vsub.f32 %v2436_v41, %v929_v43  ;;  %v2695_v8 = vsub.f32 %v2439_v54, %v929_v43  ;;  %v1203_v63 = vadd.f32 %v1680_v30, %v1678_v31 }
 0x2ff   :  { %1691 = vpow2.f32 %v1103_v25 }
 0x300   :  { %v1682_v24 = vpop.eup %1681  ;;  %v1105_v35 = vmul.f32 1.442695, %v2692_v9  ;;  %v1107_v28 = vmul.f32 1.442695, %v2695_v8  ;;  %1204 = vadd.xlane.f32.xlu0 %v1203_v63 }
 0x301   :  { %v1684_v26 = vpop.eup %1683  ;;  %v932_v59 = vpop.xlane.xlu1 %931 }
 0x302   :  { %1693 = vpow2.f32 %v1105_v35  ;;  %v2700_v42 = vsub.f32 %v2444_v4, %v932_v59  ;;  %v2703_v41 = vsub.f32 %v2447_v16, %v932_v59  ;;  %v1206_v20 = vadd.f32 %v1684_v26, %v1682_v24 }
 0x303   :  { %1695 = vpow2.f32 %v1107_v28 }
 0x304   :  { %v1686_v54 = vpop.eup %1685  ;;  %v1109_v31 = vmul.f32 1.442695, %v2700_v42  ;;  %v1111_v25 = vmul.f32 1.442695, %v2703_v41  ;;  %1207 = vadd.xlane.f32.xlu1 %v1206_v20 }
 0x305   :  { %v1688_v30 = vpop.eup %1687  ;;  %v935_v43 = vpop.xlane.xlu0 %934 }
 0x306   :  { %1697 = vpow2.f32 %v1109_v31  ;;  %v2708_v63 = vsub.f32 %v2452_v56, %v935_v43  ;;  %v2711_v4 = vsub.f32 %v2455_v2, %v935_v43  ;;  %v1209_v35 = vadd.f32 %v1688_v30, %v1686_v54 }
 0x307   :  { %1699 = vpow2.f32 %v1111_v25 }
 0x308   :  { %v1690_v16 = vpop.eup %1689  ;;  %v1113_v24 = vmul.f32 1.442695, %v2708_v63  ;;  %v1115_v28 = vmul.f32 1.442695, %v2711_v4  ;;  %1210 = vadd.xlane.f32.xlu0 %v1209_v35 }
 0x309   :  { %v1692_v26 = vpop.eup %1691  ;;  %v938_v59 = vpop.xlane.xlu1 %937 }
 0x30a   :  { %1701 = vpow2.f32 %v1113_v24  ;;  %v2716_v20 = vsub.f32 %v2460_v11, %v938_v59  ;;  %v2719_v56 = vsub.f32 %v2463_v23, %v938_v59  ;;  %v1212_v31 = vadd.f32 %v1692_v26, %v1690_v16 }
 0x30b   :  { %1703 = vpow2.f32 %v1115_v28 }
 0x30c   :  { %v1694_v2 = vpop.eup %1693  ;;  %v1117_v54 = vmul.f32 1.442695, %v2716_v20  ;;  %v1119_v25 = vmul.f32 1.442695, %v2719_v56  ;;  %1213 = vadd.xlane.f32.xlu1 %v1212_v31 }
 0x30d   :  { %v1696_v30 = vpop.eup %1695  ;;  %v941_v43 = vpop.xlane.xlu0 %940 }
 0x30e   :  { %1705 = vpow2.f32 %v1117_v54  ;;  %v2724_v35 = vsub.f32 %v2468_v18, %v941_v43  ;;  %v2727_v11 = vsub.f32 %v2471_v32, %v941_v43  ;;  %v1215_v24 = vadd.f32 %v1696_v30, %v1694_v2 }
 0x30f   :  { %1707 = vpow2.f32 %v1119_v25 }
 0x310   :  { %v1698_v23 = vpop.eup %1697  ;;  %v1121_v16 = vmul.f32 1.442695, %v2724_v35  ;;  %v1123_v28 = vmul.f32 1.442695, %v2727_v11  ;;  %1216 = vadd.xlane.f32.xlu0 %v1215_v24 }
 0x311   :  { %v1700_v26 = vpop.eup %1699  ;;  %v944_v59 = vpop.xlane.xlu1 %943 }
 0x312   :  { %1709 = vpow2.f32 %v1121_v16  ;;  %v2732_v31 = vsub.f32 %v2476_v39, %v944_v59  ;;  %v2735_v18 = vsub.f32 %v2479_v60, %v944_v59  ;;  %v1218_v54 = vadd.f32 %v1700_v26, %v1698_v23 }
 0x313   :  { %1711 = vpow2.f32 %v1123_v28 }
 0x314   :  { %2939 = vst [vmem:[#allocation26_spill] sm:$0xff] %v2732_v31  ;;  %2940 = vst [vmem:[#allocation27_spill] sm:$0xff] %v2735_v18  ;;  %v1702_v32 = vpop.eup %1701  ;;  %v1125_v2 = vmul.f32 1.442695, %v2732_v31  ;;  %v1127_v25 = vmul.f32 1.442695, %v2735_v18  ;;  %1219 = vadd.xlane.f32.xlu1 %v1218_v54 }
 0x315   :  { %v1704_v30 = vpop.eup %1703  ;;  %v947_v43 = vpop.xlane.xlu0 %946  ;;  %v2943_v54 = vld [vmem:[#allocation12_spill] sm:$0xff] }
 0x316   :  { %1713 = vpow2.f32 %v1125_v2  ;;  %v2740_v24 = vsub.f32 %v2484_v38, %v947_v43  ;;  %v2743_v39 = vsub.f32 %v2487_v62, %v947_v43  ;;  %v1221_v16 = vadd.f32 %v1704_v30, %v1702_v32  ;;  %v2945_v2 = vld [vmem:[#allocation13_spill] sm:$0xff] }
 0x317   :  { %1715 = vpow2.f32 %v1127_v25 }
 0x318   :  { %2941 = vst [vmem:[#allocation28_spill] sm:$0xff] %v2740_v24  ;;  %2942 = vst [vmem:[#allocation29_spill] sm:$0xff] %v2743_v39  ;;  %v1706_v60 = vpop.eup %1705  ;;  %v1129_v23 = vmul.f32 1.442695, %v2740_v24  ;;  %v1131_v28 = vmul.f32 1.442695, %v2743_v39  ;;  %1222 = vadd.xlane.f32.xlu0 %v1221_v16 }
 0x319   :  { %v1708_v26 = vpop.eup %1707  ;;  %v950_v59 = vpop.xlane.xlu1 %949  ;;  %v2947_v16 = vld [vmem:[#allocation14_spill] sm:$0xff] }
 0x31a   :  { %1717 = vpow2.f32 %v1129_v23  ;;  %v2748_v18 = vsub.f32 %v2943_v54, %v950_v59  ;;  %v2751_v38 = vsub.f32 %v2945_v2, %v950_v59  ;;  %v1224_v31 = vadd.f32 %v1708_v26, %v1706_v60  ;;  %v2949_v23 = vld [vmem:[#allocation15_spill] sm:$0xff] }
 0x31b   :  { %1719 = vpow2.f32 %v1131_v28 }
 0x31c   :  { %2944 = vst [vmem:[#allocation12_spill] sm:$0xff] %v2748_v18  ;;  %2946 = vst [vmem:[#allocation13_spill] sm:$0xff] %v2751_v38  ;;  %v1710_v62 = vpop.eup %1709  ;;  %v1133_v32 = vmul.f32 1.442695, %v2748_v18  ;;  %v1135_v25 = vmul.f32 1.442695, %v2751_v38  ;;  %1225 = vadd.xlane.f32.xlu1 %v1224_v31 }
 0x31d   :  { %v1712_v30 = vpop.eup %1711  ;;  %v953_v43 = vpop.xlane.xlu0 %952  ;;  %v2951_v31 = vld [vmem:[#allocation16_spill] sm:$0xff] }
 0x31e   :  { %1721 = vpow2.f32 %v1133_v32  ;;  %v2756_v39 = vsub.f32 %v2947_v16, %v953_v43  ;;  %v2759_v54 = vsub.f32 %v2949_v23, %v953_v43  ;;  %v1227_v24 = vadd.f32 %v1712_v30, %v1710_v62  ;;  %v2952_v32 = vld [vmem:[#allocation17_spill] sm:$0xff] }
 0x31f   :  { %1723 = vpow2.f32 %v1135_v25 }
 0x320   :  { %2948 = vst [vmem:[#allocation14_spill] sm:$0xff] %v2756_v39  ;;  %2950 = vst [vmem:[#allocation15_spill] sm:$0xff] %v2759_v54  ;;  %v1714_v59 = vpop.eup %1713  ;;  %v1137_v60 = vmul.f32 1.442695, %v2756_v39  ;;  %v1139_v28 = vmul.f32 1.442695, %v2759_v54  ;;  %1228 = vadd.xlane.f32.xlu0 %v1227_v24 }
 0x321   :  { %v1716_v26 = vpop.eup %1715  ;;  %v956_v2 = vpop.xlane.xlu1 %955  ;;  %v2954_v24 = vld [vmem:[#allocation18_spill] sm:$0xff] }
 0x322   :  { %1725 = vpow2.f32 %v1137_v60  ;;  %v2764_v38 = vsub.f32 %v2951_v31, %v956_v2  ;;  %v2767_v16 = vsub.f32 %v2952_v32, %v956_v2  ;;  %v1230_v18 = vadd.f32 %v1716_v26, %v1714_v59  ;;  %v2955_v60 = vld [vmem:[#allocation19_spill] sm:$0xff] }
 0x323   :  { %1727 = vpow2.f32 %v1139_v28 }
 0x324   :  { %2953 = vst [vmem:[#allocation16_spill] sm:$0xff] %v2767_v16  ;;  %v1718_v43 = vpop.eup %1717  ;;  %v1141_v62 = vmul.f32 1.442695, %v2764_v38  ;;  %v1143_v25 = vmul.f32 1.442695, %v2767_v16  ;;  %1231 = vadd.xlane.f32.xlu1 %v1230_v18 }
 0x325   :  { %v1720_v30 = vpop.eup %1719  ;;  %v959_v23 = vpop.xlane.xlu0 %958 }
 0x326   :  { %1729 = vpow2.f32 %v1141_v62  ;;  %v2772_v54 = vsub.f32 %v2954_v24, %v959_v23  ;;  %v2775_v31 = vsub.f32 %v2955_v60, %v959_v23  ;;  %v1233_v39 = vadd.f32 %v1720_v30, %v1718_v43  ;;  %v2957_v62 = vld [vmem:[#allocation20_spill] sm:$0xff] }
 0x327   :  { %1731 = vpow2.f32 %v1143_v25 }
 0x328   :  { %2956 = vst [vmem:[#allocation17_spill] sm:$0xff] %v2775_v31  ;;  %v1722_v2 = vpop.eup %1721  ;;  %v1145_v59 = vmul.f32 1.442695, %v2772_v54  ;;  %v1147_v28 = vmul.f32 1.442695, %v2775_v31  ;;  %1234 = vadd.xlane.f32.xlu0 %v1233_v39 }
 0x329   :  { %v1724_v26 = vpop.eup %1723  ;;  %v962_v32 = vpop.xlane.xlu1 %961 }
 0x32a   :  { %1733 = vpow2.f32 %v1145_v59  ;;  %v2780_v18 = vsub.f32 %v2524_v53, %v962_v32  ;;  %v2783_v24 = vsub.f32 %v2957_v62, %v962_v32  ;;  %v1236_v16 = vadd.f32 %v1724_v26, %v1722_v2  ;;  %v2958_v59 = vld [vmem:[#allocation21_spill] sm:$0xff] }
 0x32b   :  { %1735 = vpow2.f32 %v1147_v28 }
 0x32c   :  { %v1726_v23 = vpop.eup %1725  ;;  %v1149_v43 = vmul.f32 1.442695, %v2780_v18  ;;  %v1151_v25 = vmul.f32 1.442695, %v2783_v24  ;;  %1237 = vadd.xlane.f32.xlu1 %v1236_v16 }
 0x32d   :  { %v1728_v30 = vpop.eup %1727  ;;  %v965_v60 = vpop.xlane.xlu0 %964 }
 0x32e   :  { %1737 = vpow2.f32 %v1149_v43  ;;  %v2788_v39 = vsub.f32 %v2532_v13, %v965_v60  ;;  %v2791_v53 = vsub.f32 %v2958_v59, %v965_v60  ;;  %v1239_v31 = vadd.f32 %v1728_v30, %v1726_v23 }
 0x32f   :  { %1739 = vpow2.f32 %v1151_v25 }
 0x330   :  { %2959 = vst [vmem:[#allocation18_spill] sm:$0xff] %v2791_v53  ;;  %v1730_v32 = vpop.eup %1729  ;;  %v1153_v2 = vmul.f32 1.442695, %v2788_v39  ;;  %v1155_v28 = vmul.f32 1.442695, %v2791_v53  ;;  %1240 = vadd.xlane.f32.xlu0 %v1239_v31 }
 0x331   :  { %v1732_v26 = vpop.eup %1731  ;;  %v968_v62 = vpop.xlane.xlu1 %967 }
 0x332   :  { %1741 = vpow2.f32 %v1153_v2  ;;  %v2796_v16 = vsub.f32 %v2540_v51, %v968_v62  ;;  %v2799_v13 = vsub.f32 %v2543_v48, %v968_v62  ;;  %v1242_v43 = vadd.f32 %v1732_v26, %v1730_v32 }
 0x333   :  { %1743 = vpow2.f32 %v1155_v28 }
 0x334   :  { %2960 = vst [vmem:[#allocation19_spill] sm:$0xff] %v2796_v16  ;;  %v1734_v60 = vpop.eup %1733  ;;  %v1157_v23 = vmul.f32 1.442695, %v2796_v16  ;;  %v1159_v25 = vmul.f32 1.442695, %v2799_v13  ;;  %1243 = vadd.xlane.f32.xlu1 %v1242_v43 }
 0x335   :  { %v1736_v30 = vpop.eup %1735 }
 0x336   :  { %1745 = vpow2.f32 %v1157_v23  ;;  %v1245_v31 = vadd.f32 %v1736_v30, %v1734_v60 }
 0x337   :  { %1747 = vpow2.f32 %v1159_v25 }
 0x338   :  { %v1738_v59 = vpop.eup %1737  ;;  %1246 = vadd.xlane.f32.xlu0 %v1245_v31 }
 0x339   :  { %v1740_v2 = vpop.eup %1739 }
 0x33a   :  { %v1248_v51 = vadd.f32 %v1740_v2, %v1738_v59 }
 0x33c   :  { %v1742_v53 = vpop.eup %1741  ;;  %1249 = vadd.xlane.f32.xlu1 %v1248_v51 }
 0x33d   :  { %v1744_v48 = vpop.eup %1743 }
 0x33e   :  { %v1251_v62 = vadd.f32 %v1744_v48, %v1742_v53 }
 0x340   :  { %v1746_v32 = vpop.eup %1745  ;;  %1252 = vadd.xlane.f32.xlu0 %v1251_v62 }
 0x341   :  { %v1748_v28 = vpop.eup %1747 }
 0x342   :  { %v1254_v26 = vadd.f32 %v1748_v28, %v1746_v32 }
 0x344   :  { %1255 = vadd.xlane.f32.xlu1 %v1254_v26  ;;  %v2961_v26 = vld [vmem:[#allocation22_spill] sm:$0xff] }
 0x355   :  { %v1163_v16 = vpop.xlane.xlu0 %1162 }
 0x356   :  { %1749 = vlog2.f32 %v1163_v16 }
 0x359   :  { %v1166_v43 = vpop.xlane.xlu1 %1165 }
 0x35a   :  { %1751 = vlog2.f32 %v1166_v43  ;;  %v2962_v43 = vld [vmem:[#allocation23_spill] sm:$0xff] }
 0x35d   :  { %v1169_v23 = vpop.xlane.xlu0 %1168 }
 0x35e   :  { %1753 = vlog2.f32 %v1169_v23 }
 0x360   :  { %v1750_v60 = vpop.eup %1749 }
 0x361   :  { %v1258_v25 = vmul.f32 0.6931472, %v1750_v60  ;;  %v1172_v30 = vpop.xlane.xlu1 %1171 }
 0x362   :  { %1755 = vlog2.f32 %v1172_v30  ;;  %v2963_v30 = vld [vmem:[#allocation24_spill] sm:$0xff] }
 0x363   :  { %v1321_v31 = vsub.f32 %v2548_v17, %v1258_v25  ;;  %v1322_v59 = vsub.f32 %v2551_v44, %v1258_v25 }
 0x364   :  { %v1752_v53 = vpop.eup %1751 }
 0x365   :  { %1385 = vst [vmem:[#allocation8] sm:$0xff] %v1321_v31  ;;  %1386 = vst [vmem:[#allocation8 + $0x8] sm:$0xff] %v1322_v59  ;;  %v1260_v2 = vmul.f32 0.6931472, %v1752_v53  ;;  %v1175_v51 = vpop.xlane.xlu0 %1174  ;;  %v2964_v31 = vld [vmem:[#allocation25_spill] sm:$0xff] }
 0x366   :  { %1757 = vlog2.f32 %v1175_v51 }
 0x367   :  { %v1323_v16 = vsub.f32 %v2556_v29, %v1260_v2  ;;  %v1324_v48 = vsub.f32 %v2559_v61, %v1260_v2 }
 0x368   :  { %v1754_v62 = vpop.eup %1753 }
 0x369   :  { %1387 = vst [vmem:[#allocation8 + $0x10] sm:$0xff] %v1323_v16  ;;  %1388 = vst [vmem:[#allocation8 + $0x18] sm:$0xff] %v1324_v48  ;;  %v1262_v32 = vmul.f32 0.6931472, %v1754_v62  ;;  %v1178_v28 = vpop.xlane.xlu1 %1177 }
 0x36a   :  { %1759 = vlog2.f32 %v1178_v28 }
 0x36b   :  { %v1325_v17 = vsub.f32 %v2961_v26, %v1262_v32  ;;  %v1326_v44 = vsub.f32 %v2962_v43, %v1262_v32 }
 0x36c   :  { %v1756_v23 = vpop.eup %1755 }
 0x36d   :  { %1389 = vst [vmem:[#allocation8 + $0x20] sm:$0xff] %v1325_v17  ;;  %1390 = vst [vmem:[#allocation8 + $0x28] sm:$0xff] %v1326_v44  ;;  %v1264_v60 = vmul.f32 0.6931472, %v1756_v23  ;;  %v1181_v25 = vpop.xlane.xlu0 %1180 }
 0x36e   :  { %1761 = vlog2.f32 %v1181_v25 }
 0x36f   :  { %v1327_v29 = vsub.f32 %v2963_v30, %v1264_v60  ;;  %v1328_v61 = vsub.f32 %v2964_v31, %v1264_v60 }
 0x370   :  { %v1758_v59 = vpop.eup %1757 }
 0x371   :  { %1391 = vst [vmem:[#allocation8 + $0x30] sm:$0xff] %v1327_v29  ;;  %1392 = vst [vmem:[#allocation8 + $0x38] sm:$0xff] %v1328_v61  ;;  %v1266_v53 = vmul.f32 0.6931472, %v1758_v59  ;;  %v1184_v2 = vpop.xlane.xlu1 %1183 }
 0x372   :  { %1763 = vlog2.f32 %v1184_v2 }
 0x373   :  { %v1329_v51 = vsub.f32 %v2580_v50, %v1266_v53  ;;  %v1330_v16 = vsub.f32 %v2583_v57, %v1266_v53 }
 0x374   :  { %v1760_v48 = vpop.eup %1759 }
 0x375   :  { %1393 = vst [vmem:[#allocation8 + $0x40] sm:$0xff] %v1329_v51  ;;  %1394 = vst [vmem:[#allocation8 + $0x48] sm:$0xff] %v1330_v16  ;;  %v1268_v62 = vmul.f32 0.6931472, %v1760_v48  ;;  %v1187_v32 = vpop.xlane.xlu0 %1186 }
 0x376   :  { %1765 = vlog2.f32 %v1187_v32 }
 0x377   :  { %v1331_v28 = vsub.f32 %v2588_v27, %v1268_v62  ;;  %v1332_v26 = vsub.f32 %v2591_v22, %v1268_v62 }
 0x378   :  { %v1762_v17 = vpop.eup %1761 }
 0x379   :  { %1395 = vst [vmem:[#allocation8 + $0x50] sm:$0xff] %v1331_v28  ;;  %1396 = vst [vmem:[#allocation8 + $0x58] sm:$0xff] %v1332_v26  ;;  %v1270_v43 = vmul.f32 0.6931472, %v1762_v17  ;;  %v1190_v44 = vpop.xlane.xlu1 %1189 }
 0x37a   :  { %1767 = vlog2.f32 %v1190_v44 }
 0x37b   :  { %v1333_v50 = vsub.f32 %v2596_v45, %v1270_v43  ;;  %v1334_v57 = vsub.f32 %v2599_v14, %v1270_v43 }
 0x37c   :  { %v1764_v23 = vpop.eup %1763 }
 0x37d   :  { %1397 = vst [vmem:[#allocation8 + $0x60] sm:$0xff] %v1333_v50  ;;  %1398 = vst [vmem:[#allocation8 + $0x68] sm:$0xff] %v1334_v57  ;;  %v1272_v60 = vmul.f32 0.6931472, %v1764_v23  ;;  %v1193_v25 = vpop.xlane.xlu0 %1192 }
 0x37e   :  { %1769 = vlog2.f32 %v1193_v25 }
 0x37f   :  { %v1335_v27 = vsub.f32 %v2604_v1, %v1272_v60  ;;  %v1336_v22 = vsub.f32 %v2607_v47, %v1272_v60 }
 0x380   :  { %v1766_v30 = vpop.eup %1765 }
 0x381   :  { %1399 = vst [vmem:[#allocation8 + $0x70] sm:$0xff] %v1335_v27  ;;  %1400 = vst [vmem:[#allocation8 + $0x78] sm:$0xff] %v1336_v22  ;;  %v1274_v29 = vmul.f32 0.6931472, %v1766_v30  ;;  %v1196_v31 = vpop.xlane.xlu1 %1195 }
 0x382   :  { %1771 = vlog2.f32 %v1196_v31 }
 0x383   :  { %v1337_v45 = vsub.f32 %v2612_v5, %v1274_v29  ;;  %v1338_v14 = vsub.f32 %v2615_v0, %v1274_v29 }
 0x384   :  { %v1768_v61 = vpop.eup %1767 }
 0x385   :  { %1401 = vst [vmem:[#allocation8 + $0x80] sm:$0xff] %v1337_v45  ;;  %1402 = vst [vmem:[#allocation8 + $0x88] sm:$0xff] %v1338_v14  ;;  %v1276_v59 = vmul.f32 0.6931472, %v1768_v61  ;;  %v1199_v53 = vpop.xlane.xlu0 %1198 }
 0x386   :  { %1773 = vlog2.f32 %v1199_v53 }
 0x387   :  { %v1339_v1 = vsub.f32 %v2620_v10, %v1276_v59  ;;  %v1340_v47 = vsub.f32 %v2623_v12, %v1276_v59 }
 0x388   :  { %v1770_v2 = vpop.eup %1769 }
 0x389   :  { %1403 = vst [vmem:[#allocation8 + $0x90] sm:$0xff] %v1339_v1  ;;  %1404 = vst [vmem:[#allocation8 + $0x98] sm:$0xff] %v1340_v47  ;;  %v1278_v51 = vmul.f32 0.6931472, %v1770_v2  ;;  %v1202_v16 = vpop.xlane.xlu1 %1201 }
 0x38a   :  { %1775 = vlog2.f32 %v1202_v16 }
 0x38b   :  { %v1341_v5 = vsub.f32 %v2628_v37, %v1278_v51  ;;  %v1342_v0 = vsub.f32 %v2631_v33, %v1278_v51 }
 0x38c   :  { %v1772_v48 = vpop.eup %1771 }
 0x38d   :  { %1405 = vst [vmem:[#allocation8 + $0xa0] sm:$0xff] %v1341_v5  ;;  %1406 = vst [vmem:[#allocation8 + $0xa8] sm:$0xff] %v1342_v0  ;;  %v1280_v62 = vmul.f32 0.6931472, %v1772_v48  ;;  %v1205_v32 = vpop.xlane.xlu0 %1204 }
 0x38e   :  { %1777 = vlog2.f32 %v1205_v32 }
 0x38f   :  { %v1343_v10 = vsub.f32 %v2636_v6, %v1280_v62  ;;  %v1344_v12 = vsub.f32 %v2639_v49, %v1280_v62 }
 0x390   :  { %v1774_v28 = vpop.eup %1773 }
 0x391   :  { %1407 = vst [vmem:[#allocation8 + $0xb0] sm:$0xff] %v1343_v10  ;;  %1408 = vst [vmem:[#allocation8 + $0xb8] sm:$0xff] %v1344_v12  ;;  %v1282_v26 = vmul.f32 0.6931472, %v1774_v28  ;;  %v1208_v17 = vpop.xlane.xlu1 %1207 }
 0x392   :  { %1779 = vlog2.f32 %v1208_v17 }
 0x393   :  { %v1345_v37 = vsub.f32 %v2644_v36, %v1282_v26  ;;  %v1346_v33 = vsub.f32 %v2647_v3, %v1282_v26 }
 0x394   :  { %v1776_v43 = vpop.eup %1775 }
 0x395   :  { %1409 = vst [vmem:[#allocation8 + $0xc0] sm:$0xff] %v1345_v37  ;;  %1410 = vst [vmem:[#allocation8 + $0xc8] sm:$0xff] %v1346_v33  ;;  %v1284_v44 = vmul.f32 0.6931472, %v1776_v43  ;;  %v1211_v50 = vpop.xlane.xlu0 %1210  ;;  %v2965_v33 = vld [vmem:[#allocation26_spill] sm:$0xff]  ;;  %v2966_v43 = vld [vmem:[#allocation27_spill] sm:$0xff] }
 0x396   :  { %1781 = vlog2.f32 %v1211_v50 }
 0x397   :  { %v1347_v6 = vsub.f32 %v2652_v15, %v1284_v44  ;;  %v1348_v49 = vsub.f32 %v2655_v19, %v1284_v44 }
 0x398   :  { %v1778_v57 = vpop.eup %1777 }
 0x399   :  { %1411 = vst [vmem:[#allocation8 + $0xd0] sm:$0xff] %v1347_v6  ;;  %1412 = vst [vmem:[#allocation8 + $0xd8] sm:$0xff] %v1348_v49  ;;  %v1286_v23 = vmul.f32 0.6931472, %v1778_v57  ;;  %v1214_v60 = vpop.xlane.xlu1 %1213  ;;  %v2967_v49 = vld [vmem:[#allocation28_spill] sm:$0xff]  ;;  %v2968_v57 = vld [vmem:[#allocation29_spill] sm:$0xff] }
 0x39a   :  { %1783 = vlog2.f32 %v1214_v60 }
 0x39b   :  { %v1349_v36 = vsub.f32 %v2660_v46, %v1286_v23  ;;  %v1350_v3 = vsub.f32 %v2663_v58, %v1286_v23 }
 0x39c   :  { %v1780_v25 = vpop.eup %1779 }
 0x39d   :  { %1413 = vst [vmem:[#allocation8 + $0xe0] sm:$0xff] %v1349_v36  ;;  %1414 = vst [vmem:[#allocation8 + $0xe8] sm:$0xff] %v1350_v3  ;;  %v1288_v27 = vmul.f32 0.6931472, %v1780_v25  ;;  %v1217_v22 = vpop.xlane.xlu0 %1216  ;;  %v2969_v3 = vld [vmem:[#allocation12_spill] sm:$0xff] }
 0x39e   :  { %1785 = vlog2.f32 %v1217_v22 }
 0x39f   :  { %v1351_v15 = vsub.f32 %v2668_v21, %v1288_v27  ;;  %v1352_v19 = vsub.f32 %v2671_v34, %v1288_v27  ;;  %v2970_v27 = vld [vmem:[#allocation13_spill] sm:$0xff] }
 0x3a0   :  { %v1782_v30 = vpop.eup %1781 }
 0x3a1   :  { %1415 = vst [vmem:[#allocation8 + $0xf0] sm:$0xff] %v1351_v15  ;;  %1416 = vst [vmem:[#allocation8 + $0xf8] sm:$0xff] %v1352_v19  ;;  %v1290_v29 = vmul.f32 0.6931472, %v1782_v30  ;;  %v1220_v31 = vpop.xlane.xlu1 %1219 }
 0x3a2   :  { %1787 = vlog2.f32 %v1220_v31 }
 0x3a3   :  { %v1353_v46 = vsub.f32 %v2676_v40, %v1290_v29  ;;  %v1354_v58 = vsub.f32 %v2679_v7, %v1290_v29  ;;  %v2971_v29 = vld [vmem:[#allocation14_spill] sm:$0xff] }
 0x3a4   :  { %v1784_v45 = vpop.eup %1783 }
 0x3a5   :  { %1417 = vst [vmem:[#allocation8 + $0x100] sm:$0xff] %v1353_v46  ;;  %1418 = vst [vmem:[#allocation8 + $0x108] sm:$0xff] %v1354_v58  ;;  %v1292_v14 = vmul.f32 0.6931472, %v1784_v45  ;;  %v1223_v61 = vpop.xlane.xlu0 %1222  ;;  %v2972_v46 = vld [vmem:[#allocation15_spill] sm:$0xff] }
 0x3a6   :  { %1789 = vlog2.f32 %v1223_v61 }
 0x3a7   :  { %v1355_v21 = vsub.f32 %v2684_v55, %v1292_v14  ;;  %v1356_v34 = vsub.f32 %v2687_v52, %v1292_v14 }
 0x3a8   :  { %v1786_v59 = vpop.eup %1785 }
 0x3a9   :  { %1419 = vst [vmem:[#allocation8 + $0x110] sm:$0xff] %v1355_v21  ;;  %1420 = vst [vmem:[#allocation8 + $0x118] sm:$0xff] %v1356_v34  ;;  %v1294_v53 = vmul.f32 0.6931472, %v1786_v59  ;;  %v1226_v1 = vpop.xlane.xlu1 %1225  ;;  %v2973_v34 = vld [vmem:[#allocation16_spill] sm:$0xff] }
 0x3aa   :  { %1791 = vlog2.f32 %v1226_v1 }
 0x3ab   :  { %v1357_v40 = vsub.f32 %v2692_v9, %v1294_v53  ;;  %v1358_v7 = vsub.f32 %v2695_v8, %v1294_v53 }
 0x3ac   :  { %v1788_v47 = vpop.eup %1787 }
 0x3ad   :  { %1421 = vst [vmem:[#allocation8 + $0x120] sm:$0xff] %v1357_v40  ;;  %1422 = vst [vmem:[#allocation8 + $0x128] sm:$0xff] %v1358_v7  ;;  %v1296_v2 = vmul.f32 0.6931472, %v1788_v47  ;;  %v1229_v51 = vpop.xlane.xlu0 %1228  ;;  %v2974_v47 = vld [vmem:[#allocation17_spill] sm:$0xff] }
 0x3ae   :  { %1793 = vlog2.f32 %v1229_v51 }
 0x3af   :  { %v1359_v55 = vsub.f32 %v2700_v42, %v1296_v2  ;;  %v1360_v52 = vsub.f32 %v2703_v41, %v1296_v2 }
 0x3b0   :  { %v1790_v16 = vpop.eup %1789 }
 0x3b1   :  { %1423 = vst [vmem:[#allocation8 + $0x130] sm:$0xff] %v1359_v55  ;;  %1424 = vst [vmem:[#allocation8 + $0x138] sm:$0xff] %v1360_v52  ;;  %v1298_v5 = vmul.f32 0.6931472, %v1790_v16  ;;  %v1232_v0 = vpop.xlane.xlu1 %1231 }
 0x3b2   :  { %1795 = vlog2.f32 %v1232_v0 }
 0x3b3   :  { %v1361_v9 = vsub.f32 %v2708_v63, %v1298_v5  ;;  %v1362_v8 = vsub.f32 %v2711_v4, %v1298_v5 }
 0x3b4   :  { %v1792_v48 = vpop.eup %1791 }
 0x3b5   :  { %1425 = vst [vmem:[#allocation8 + $0x140] sm:$0xff] %v1361_v9  ;;  %1426 = vst [vmem:[#allocation8 + $0x148] sm:$0xff] %v1362_v8  ;;  %v1300_v62 = vmul.f32 0.6931472, %v1792_v48  ;;  %v1235_v32 = vpop.xlane.xlu0 %1234  ;;  %v2975_v9 = vld [vmem:[#allocation18_spill] sm:$0xff] }
 0x3b6   :  { %1797 = vlog2.f32 %v1235_v32 }
 0x3b7   :  { %v1363_v42 = vsub.f32 %v2716_v20, %v1300_v62  ;;  %v1364_v41 = vsub.f32 %v2719_v56, %v1300_v62  ;;  %v2976_v62 = vld [vmem:[#allocation19_spill] sm:$0xff] }
 0x3b8   :  { %v1794_v10 = vpop.eup %1793 }
 0x3b9   :  { %1427 = vst [vmem:[#allocation8 + $0x150] sm:$0xff] %v1363_v42  ;;  %1428 = vst [vmem:[#allocation8 + $0x158] sm:$0xff] %v1364_v41  ;;  %v1302_v12 = vmul.f32 0.6931472, %v1794_v10  ;;  %v1238_v28 = vpop.xlane.xlu1 %1237 }
 0x3ba   :  { %1799 = vlog2.f32 %v1238_v28 }
 0x3bb   :  { %v1365_v63 = vsub.f32 %v2724_v35, %v1302_v12  ;;  %v1366_v4 = vsub.f32 %v2727_v11, %v1302_v12 }
 0x3bc   :  { %v1796_v26 = vpop.eup %1795 }
 0x3bd   :  { %1429 = vst [vmem:[#allocation8 + $0x160] sm:$0xff] %v1365_v63  ;;  %1430 = vst [vmem:[#allocation8 + $0x168] sm:$0xff] %v1366_v4  ;;  %v1304_v17 = vmul.f32 0.6931472, %v1796_v26  ;;  %v1241_v37 = vpop.xlane.xlu0 %1240 }
 0x3be   :  { %1801 = vlog2.f32 %v1241_v37 }
 0x3bf   :  { %v1367_v20 = vsub.f32 %v2965_v33, %v1304_v17  ;;  %v1368_v56 = vsub.f32 %v2966_v43, %v1304_v17 }
 0x3c0   :  { %v1798_v44 = vpop.eup %1797 }
 0x3c1   :  { %1431 = vst [vmem:[#allocation8 + $0x170] sm:$0xff] %v1367_v20  ;;  %1432 = vst [vmem:[#allocation8 + $0x178] sm:$0xff] %v1368_v56  ;;  %v1306_v50 = vmul.f32 0.6931472, %v1798_v44  ;;  %v1244_v6 = vpop.xlane.xlu1 %1243 }
 0x3c2   :  { %1803 = vlog2.f32 %v1244_v6 }
 0x3c3   :  { %v1369_v35 = vsub.f32 %v2967_v49, %v1306_v50  ;;  %v1370_v11 = vsub.f32 %v2968_v57, %v1306_v50 }
 0x3c4   :  { %v1800_v23 = vpop.eup %1799 }
 0x3c5   :  { %1433 = vst [vmem:[#allocation8 + $0x180] sm:$0xff] %v1369_v35  ;;  %1434 = vst [vmem:[#allocation8 + $0x188] sm:$0xff] %v1370_v11  ;;  %v1308_v60 = vmul.f32 0.6931472, %v1800_v23  ;;  %v1247_v36 = vpop.xlane.xlu0 %1246 }
 0x3c6   :  { %1805 = vlog2.f32 %v1247_v36 }
 0x3c7   :  { %v1371_v25 = vsub.f32 %v2969_v3, %v1308_v60  ;;  %v1372_v22 = vsub.f32 %v2970_v27, %v1308_v60 }
 0x3c8   :  { %v1802_v15 = vpop.eup %1801 }
 0x3c9   :  { %1435 = vst [vmem:[#allocation8 + $0x190] sm:$0xff] %v1371_v25  ;;  %1436 = vst [vmem:[#allocation8 + $0x198] sm:$0xff] %v1372_v22  ;;  %v1310_v19 = vmul.f32 0.6931472, %v1802_v15  ;;  %v1250_v30 = vpop.xlane.xlu1 %1249 }
 0x3ca   :  { %1807 = vlog2.f32 %v1250_v30 }
 0x3cb   :  { %v1373_v31 = vsub.f32 %v2971_v29, %v1310_v19  ;;  %v1374_v58 = vsub.f32 %v2972_v46, %v1310_v19 }
 0x3cc   :  { %v1804_v45 = vpop.eup %1803 }
 0x3cd   :  { %1437 = vst [vmem:[#allocation8 + $0x1a0] sm:$0xff] %v1373_v31  ;;  %1438 = vst [vmem:[#allocation8 + $0x1a8] sm:$0xff] %v1374_v58  ;;  %v1312_v14 = vmul.f32 0.6931472, %v1804_v45  ;;  %v1253_v61 = vpop.xlane.xlu0 %1252 }
 0x3ce   :  { %1809 = vlog2.f32 %v1253_v61 }
 0x3cf   :  { %v1375_v21 = vsub.f32 %v2764_v38, %v1312_v14  ;;  %v1376_v59 = vsub.f32 %v2973_v34, %v1312_v14 }
 0x3d0   :  { %v1806_v53 = vpop.eup %1805 }
 0x3d1   :  { %1439 = vst [vmem:[#allocation8 + $0x1b0] sm:$0xff] %v1375_v21  ;;  %1440 = vst [vmem:[#allocation8 + $0x1b8] sm:$0xff] %v1376_v59  ;;  %v1314_v1 = vmul.f32 0.6931472, %v1806_v53  ;;  %v1256_v40 = vpop.xlane.xlu1 %1255 }
 0x3d2   :  { %1811 = vlog2.f32 %v1256_v40 }
 0x3d3   :  { %v1377_v7 = vsub.f32 %v2772_v54, %v1314_v1  ;;  %v1378_v2 = vsub.f32 %v2974_v47, %v1314_v1 }
 0x3d4   :  { %v1808_v51 = vpop.eup %1807 }
 0x3d5   :  { %1441 = vst [vmem:[#allocation8 + $0x1c0] sm:$0xff] %v1377_v7  ;;  %1442 = vst [vmem:[#allocation8 + $0x1c8] sm:$0xff] %v1378_v2  ;;  %v1316_v55 = vmul.f32 0.6931472, %v1808_v51 }
 0x3d7   :  { %v1379_v52 = vsub.f32 %v2780_v18, %v1316_v55  ;;  %v1380_v38 = vsub.f32 %v2783_v24, %v1316_v55 }
 0x3d8   :  { %v1810_v16 = vpop.eup %1809 }
 0x3d9   :  { %1443 = vst [vmem:[#allocation8 + $0x1d0] sm:$0xff] %v1379_v52  ;;  %1444 = vst [vmem:[#allocation8 + $0x1d8] sm:$0xff] %v1380_v38  ;;  %v1318_v5 = vmul.f32 0.6931472, %v1810_v16 }
 0x3db   :  { %v1381_v0 = vsub.f32 %v2788_v39, %v1318_v5  ;;  %v1382_v8 = vsub.f32 %v2975_v9, %v1318_v5 }
 0x3dc   :  { %v1812_v48 = vpop.eup %1811 }
 0x3dd   :  { %1445 = vst [vmem:[#allocation8 + $0x1e0] sm:$0xff] %v1381_v0  ;;  %1446 = vst [vmem:[#allocation8 + $0x1e8] sm:$0xff] %v1382_v8  ;;  %v1320_v54 = vmul.f32 0.6931472, %v1812_v48 }
 0x3df   :  { %v1383_v32 = vsub.f32 %v2976_v62, %v1320_v54  ;;  %v1384_v18 = vsub.f32 %v2799_v13, %v1320_v54 }
 0x3e1   :  { %1447 = vst [vmem:[#allocation8 + $0x1f0] sm:$0xff] %v1383_v32  ;;  %1448 = vst [vmem:[#allocation8 + $0x1f8] sm:$0xff] %v1384_v18 }
 0x3e2   :  { %1890 = shalt.err (!%p1887_p0)
}
 0x3e3   :  { %s1891_s6 = scalar_lea.hbm %s2886_s4, 8192 }
 0x3e4   :  { %p1892_p1 = scmp.ne.s32.totalorder %s2886_s4, %s1891_s6  ;;  %p1895_p2 = scmp.lt.u32.totalorder %s1891_s6, %s2886_s4 }
 0x3e6   :  { %p1897_p3 = pnand %p1895_p2, %p1892_p1 }
 0x3e8   :  { %1900 = shalt.err (!%p1897_p3)
}
 0x3e9   :  { %1460 = dma.vmem_to_hbm [thread:$0]  %s1455_s28, 8192, %s2886_s4, [#allocation4], %s1911_s1, %s1911_s1, %s1912_s13  }
 0x3ea   :  { %1905 = dma.done.wait [#allocation4], 8192  }
 0x3eb   :  { %1906 = vsyncadd [#allocation4], 4294959104 }
 0x3ec   :  { %1464 = vsyncpa [#allocation3], 1 }
 0x3ed   :  { %1465 = vsyncpa [#allocation6], 1 }
 0x3ee   :  { %1466 = vsyncpa [#allocation4], 1 }

</bundles_post_ra>
